<compile_context>
chip_gen: v7x
topology: tpu7x:2x2x1
jax: 0.10.0
libtpu: 0.0.40
codegen_flags: <defaults>
</compile_context>

<pallas_src>
import numpy as np
import jax
import jax.numpy as jnp
from jax import lax
from jax.experimental import pallas as pl
from jax.experimental.pallas import tpu as pltpu

PAD = 0  # Constants.PAD


def position_encoding_init(n_position, d_pos_vec):
    """Sinusoid position encoding table (exact port of the PyTorch helper)."""
    position_enc = np.array(
        [
            [pos / np.power(10000, 2 * (j // 2) / d_pos_vec) for j in range(d_pos_vec)]
            if pos != 0
            else np.zeros(d_pos_vec)
            for pos in range(n_position)
        ]
    )
    position_enc[1:, 0::2] = np.sin(position_enc[1:, 0::2])
    position_enc[1:, 1::2] = np.cos(position_enc[1:, 1::2])
    return jnp.asarray(position_enc, dtype=jnp.float32)


def _embed_kernel(ids_ref, w_hbm, pos_ref, out_ref, wbuf, sem):
    # ids_ref: (B*T_pad,) int32 SMEM (scalar prefetch) -- pre-clipped token ids
    # w_hbm:   (V, D) f32 HBM                          -- word embedding table
    # pos_ref: (tq, D) f32 VMEM (auto-pipelined)       -- pos-encoding rows of this tile
    # out_ref: (tq, D) f32 VMEM                        -- output tile
    # wbuf:    (2*tq, D) f32 VMEM scratch              -- double-buffered row-gather dest
    # sem:     DMA semaphores, shape (2,)              -- one per buffer slot
    b = pl.program_id(0)
    t = pl.program_id(1)
    n_t = pl.num_programs(1)
    tq, _ = out_ref.shape
    T_pad = n_t * tq
    slot = t & 1

    def issue_tile(tile_t, sl):
        # Issue all tq word-row gathers of tile (b, tile_t) into buffer slot sl.
        ids_base = b * T_pad + tile_t * tq
        buf_base = sl * tq

        def body(i, carry):
            tok = ids_ref[ids_base + i]          # already clipped in the wrapper
            pltpu.make_async_copy(w_hbm.at[tok], wbuf.at[buf_base + i],
                                  sem.at[sl]).start()
            return carry

        lax.fori_loop(0, tq, body, 0, unroll=8)

    # Prologue of each batch row: issue the current (first) tile.
    @pl.when(t == 0)
    def _():
        issue_tile(0, 0)

    # Prefetch the NEXT tile of this batch row before waiting on the current
    # one, so its gather latency overlaps this tile's drain/compute/writeback.
    @pl.when(t + 1 < n_t)
    def _():
        issue_tile(t + 1, (t + 1) & 1)

    # Single combined wait: the tq row copies of tile t (D*4 bytes each) were
    # all issued on sem[slot]; one descriptor sized (tq, D) drains them all.
    cur = pl.multiple_of(slot * tq, 8)
    other = pl.multiple_of((1 - slot) * tq, 8)
    pltpu.make_async_copy(wbuf.at[pl.ds(other, tq)],
                          wbuf.at[pl.ds(cur, tq)],
                          sem.at[slot]).wait()

    # Fused positional-encoding add, lane-dense store of the whole tile.
    out_ref[...] = wbuf[pl.ds(cur, tq), :] + pos_ref[...]


def embedder_forward(src_seq, word_emb_table, pos_enc_table, src_pos=None,
                     seq_tile=256):
    """
    Equivalent of Embedder.forward for the int-token-id path.
    Returns (enc_input, src_seq_for_masking), matching the PyTorch module.
    """
    # --- InputSequenceNormalizer (int path) ---------------------------------
    if jnp.issubdtype(src_seq.dtype, jnp.floating) and src_seq.ndim == 3:
        # TODO(synk): float_input path (transform_to_d_model Linear) not implemented.
        raise NotImplementedError("float_input path not implemented")
    if src_seq.ndim == 3:
        # 3d one-hot long input -> argmax over vocab dim (torch.max(...,2)[-1]).
        # NOTE: argmax tie-breaking may differ from torch for non-one-hot ties.
        src_seq = jnp.argmax(src_seq, axis=2)
    src_seq = src_seq.astype(jnp.int32)
    src_seq_for_masking = src_seq
    # TODO(synk): include_predefined concat + transform_to_d_model and
    # custom_embedder are off in the default config and not implemented.

    B, T = src_seq.shape
    V, D = word_emb_table.shape
    NP = pos_enc_table.shape[0]

    # --- sequence tile size (sublane aligned, VMEM-budget aware) ------------
    tq = max(8, min(int(seq_tile), ((T + 7) // 8) * 8))
    tq = max(8, (tq // 8) * 8)
    # per-step footprint ~ 6*tq*D*4 (wbuf x2 + out x2 + pos x2); keep <= ~24 MiB
    while 6 * tq * D * 4 > 24 * 2**20 and tq > 8:
        tq = max(8, (tq // 2 // 8) * 8)
    n_t = -(-T // tq)
    T_pad = n_t * tq

    # --- token ids: clip invalid -> PAD (zero row), pad, flatten to SMEM ----
    # TODO(synk): for very long contexts (B*T >> 100K) chunk the pallas_call so
    # the scalar-prefetch id array does not exhaust SMEM.
    ids = jnp.where((src_seq >= 0) & (src_seq < V), src_seq, PAD)
    if T_pad != T:
        ids = jnp.pad(ids, ((0, 0), (0, T_pad - T)), constant_values=PAD)
    ids_flat = ids.reshape(B * T_pad)

    # --- positional-encoding rows: streamed via BlockSpec, no in-kernel gather
    if src_pos is None:
        # positions are arange(T): rows of the pos table are contiguous per tile
        pos_slab = pos_enc_table[:T]
        if pos_slab.shape[0] != T_pad:
            pos_slab = jnp.pad(pos_slab, ((0, T_pad - pos_slab.shape[0]), (0, 0)))
        pos_slab = pos_slab[None]                      # (1, T_pad, D)
        pos_index_map = lambda b, t, ids: (0, t, 0)
    else:
        # TODO(synk): explicit src_pos is materialized by an XLA gather in the
        # wrapper; an in-kernel row-DMA gather (like the word table) would halve
        # the HBM traffic for this (uncommon) path.
        pos = jnp.clip(src_pos.astype(jnp.int32), 0, NP - 1)
        pos_slab = pos_enc_table[pos]                  # (B, T, D)
        if T_pad != T:
            pos_slab = jnp.pad(pos_slab, ((0, 0), (0, T_pad - T), (0, 0)))
        pos_index_map = lambda b, t, ids: (b, t, 0)

    # TODO(synk): small-vocab fast path (whole word table VMEM-resident, no HBM
    # row DMAs) would beat the gather for toy-sized tables.

    footprint = 6 * tq * D * 4 + 2 * tq * D * 4       # tiles + slack
    vmem_limit = int(min(64 * 2**20, max(32 * 2**20, 2 * footprint)))

    out = pl.pallas_call(
        _embed_kernel,
        out_shape=jax.ShapeDtypeStruct((B, T_pad, D), jnp.float32),
        grid_spec=pltpu.PrefetchScalarGridSpec(
            num_scalar_prefetch=1,                      # token ids -> SMEM
            grid=(B, n_t),
            in_specs=[
                pl.BlockSpec(memory_space=pl.ANY),      # word emb table stays in HBM
                pl.BlockSpec((None, tq, D), pos_index_map),   # pos rows, pipelined VMEM
            ],
            out_specs=pl.BlockSpec((None, tq, D), lambda b, t, ids: (b, t, 0)),
            scratch_shapes=[
                pltpu.VMEM((2 * tq, D), jnp.float32),   # double-buffered word rows
                pltpu.SemaphoreType.DMA((2,)),          # one DMA sem per slot
            ],
        ),
        compiler_params=pltpu.CompilerParams(
            dimension_semantics=("parallel", "arbitrary"),
            vmem_limit_bytes=vmem_limit,
        ),
    )(ids_flat, word_emb_table, pos_slab)

    enc_input = out[:, :T, :]
    return enc_input, src_seq_for_masking


def make_params(n_max_seq, n_src_vocab, d_model, key):
    """Deterministic parameter init mirroring Embedder.__init__ shapes."""
    n_position = n_max_seq + 1
    pos_enc_table = position_encoding_init(n_position, d_model)      # (n_position, D)
    word_emb = jax.random.normal(key, (n_src_vocab, d_model), jnp.float32)
    word_emb = word_emb.at[PAD].set(0.0)                             # padding_idx row -> zeros
    return word_emb, pos_enc_table


if __name__ == "__main__":
    # Small shapes: batch=2, seq=12 (non-multiple of the tile -> exercises padding),
    # vocab=32, d_model=128 (lane-dense), n_max_seq=32.
    B, T = 2, 12
    n_max_seq, n_src_vocab, d_model = 32, 32, 128

    key = jax.random.PRNGKey(0)
    k_w, k_ids = jax.random.split(key)

    word_emb, pos_enc_table = make_params(n_max_seq, n_src_vocab, d_model, k_w)
    src_seq = jax.random.randint(k_ids, (B, T), 0, n_src_vocab, dtype=jnp.int32)

    # Default path: src_pos=None -> positions arange(T). seq_tile=8 -> grid (2, 2),
    # exercising the prologue, the cross-step prefetch and the combined wait.
    enc_input, masking = embedder_forward(src_seq, word_emb, pos_enc_table,
                                          seq_tile=8)
    enc_input = jax.block_until_ready(enc_input)

    ref = word_emb[src_seq] + pos_enc_table[:T][None, :, :]
    np.testing.assert_allclose(np.asarray(enc_input), np.asarray(ref),
                               rtol=1e-6, atol=1e-6)
    assert masking.shape == (B, T)

    # Explicit src_pos path: reversed positions, gathered pos slab per batch row.
    src_pos = jnp.broadcast_to(jnp.arange(T, dtype=jnp.int32)[::-1][None, :], (B, T))
    enc_input2, _ = embedder_forward(src_seq, word_emb, pos_enc_table,
                                     src_pos=src_pos, seq_tile=8)
    enc_input2 = jax.block_until_ready(enc_input2)
    ref2 = word_emb[src_seq] + pos_enc_table[src_pos]
    np.testing.assert_allclose(np.asarray(enc_input2), np.asarray(ref2),
                               rtol=1e-6, atol=1e-6)

    print("KERNEL_OK")
</pallas_src>

<mosaic_0001>
module attributes {stable_mosaic.version = 11 : i64} {
  func.func @_embed_kernel(%arg0: i32, %arg1: i32, %arg2: memref<32xi32, #tpu.memory_space<smem>>, %arg3: memref<32x128xf32, #tpu.memory_space<any>>, %arg4: memref<1x8x128xf32, #tpu.memory_space<vmem>>, %arg5: memref<1x8x128xf32, #tpu.memory_space<vmem>>, %arg6: memref<16x128xf32, #tpu.memory_space<vmem>>, %arg7: memref<2x!tpu.dma_semaphore, #tpu.memory_space<semaphore_mem>>) attributes {dimension_semantics = [#tpu.dimension_semantics<parallel>, #tpu.dimension_semantics<arbitrary>], iteration_bounds = array<i64: 2, 2>, scalar_prefetch = 1 : i64, scratch_operands = 2 : i64, tpu.core_type = #tpu.core_type<tc>, window_params = [{}, {transform_indices = @transform_1, window_bounds = array<i64: 1, 8, 128>}, {transform_indices = @transform_2, window_bounds = array<i64: 1, 8, 128>}]} {
    %c1_i32 = arith.constant 1 : i32
    %0 = arith.andi %arg1, %c1_i32 : i32
    %c0_i32 = arith.constant 0 : i32
    %1 = arith.cmpi eq, %arg1, %c0_i32 : i32
    %2 = arith.extui %1 : i1 to i32
    %c0_i32_0 = arith.constant 0 : i32
    %3 = arith.cmpi ne, %2, %c0_i32_0 : i32
    scf.if %3 {
      %c16_i32 = arith.constant 16 : i32
      %25 = arith.muli %arg0, %c16_i32 : i32
      %c0_i32_13 = arith.constant 0 : i32
      %26 = arith.addi %25, %c0_i32_13 : i32
      %c0_i32_14 = arith.constant 0 : i32
      %27 = arith.addi %26, %c0_i32_14 : i32
      %28 = arith.index_cast %27 : i32 to index
      %29 = memref.load %arg2[%28] : memref<32xi32, #tpu.memory_space<smem>>
      %c0_i32_15 = arith.constant 0 : i32
      %30 = arith.addi %c0_i32_15, %c0_i32_14 : i32
      %c0_i32_16 = arith.constant 0 : i32
      %c0_i32_17 = arith.constant 0 : i32
      %31 = tpu.memref_slice %arg3[%29, %c0_i32_17] : memref<32x128xf32, #tpu.memory_space<any>> -> memref<1x128xf32, #tpu.memory_space<any>>
      %32 = tpu.memref_squeeze %31 : memref<1x128xf32, #tpu.memory_space<any>> -> memref<128xf32, #tpu.memory_space<any>>
      %c0_i32_18 = arith.constant 0 : i32
      %33 = tpu.memref_slice %arg6[%30, %c0_i32_18] : memref<16x128xf32, #tpu.memory_space<vmem>> -> memref<1x128xf32, #tpu.memory_space<vmem>>
      %34 = tpu.memref_squeeze %33 : memref<1x128xf32, #tpu.memory_space<vmem>> -> memref<128xf32, #tpu.memory_space<vmem>>
      %35 = tpu.memref_slice %arg7[%c0_i32_16] : memref<2x!tpu.dma_semaphore, #tpu.memory_space<semaphore_mem>> -> memref<1x!tpu.dma_semaphore, #tpu.memory_space<semaphore_mem>>
      %36 = tpu.memref_squeeze %35 : memref<1x!tpu.dma_semaphore, #tpu.memory_space<semaphore_mem>> -> memref<!tpu.dma_semaphore, #tpu.memory_space<semaphore_mem>>
      tpu.enqueue_dma source(%32 : memref<128xf32, #tpu.memory_space<any>>) target(%34 : memref<128xf32, #tpu.memory_space<vmem>>) target_semaphore(%36 : memref<!tpu.dma_semaphore, #tpu.memory_space<semaphore_mem>>)
      %c1_i32_19 = arith.constant 1 : i32
      %37 = arith.addi %26, %c1_i32_19 : i32
      %38 = arith.index_cast %37 : i32 to index
      %39 = memref.load %arg2[%38] : memref<32xi32, #tpu.memory_space<smem>>
      %c0_i32_20 = arith.constant 0 : i32
      %40 = arith.addi %c0_i32_20, %c1_i32_19 : i32
      %c0_i32_21 = arith.constant 0 : i32
      %c0_i32_22 = arith.constant 0 : i32
      %41 = tpu.memref_slice %arg3[%39, %c0_i32_22] : memref<32x128xf32, #tpu.memory_space<any>> -> memref<1x128xf32, #tpu.memory_space<any>>
      %42 = tpu.memref_squeeze %41 : memref<1x128xf32, #tpu.memory_space<any>> -> memref<128xf32, #tpu.memory_space<any>>
      %c0_i32_23 = arith.constant 0 : i32
      %43 = tpu.memref_slice %arg6[%40, %c0_i32_23] : memref<16x128xf32, #tpu.memory_space<vmem>> -> memref<1x128xf32, #tpu.memory_space<vmem>>
      %44 = tpu.memref_squeeze %43 : memref<1x128xf32, #tpu.memory_space<vmem>> -> memref<128xf32, #tpu.memory_space<vmem>>
      %45 = tpu.memref_slice %arg7[%c0_i32_21] : memref<2x!tpu.dma_semaphore, #tpu.memory_space<semaphore_mem>> -> memref<1x!tpu.dma_semaphore, #tpu.memory_space<semaphore_mem>>
      %46 = tpu.memref_squeeze %45 : memref<1x!tpu.dma_semaphore, #tpu.memory_space<semaphore_mem>> -> memref<!tpu.dma_semaphore, #tpu.memory_space<semaphore_mem>>
      tpu.enqueue_dma source(%42 : memref<128xf32, #tpu.memory_space<any>>) target(%44 : memref<128xf32, #tpu.memory_space<vmem>>) target_semaphore(%46 : memref<!tpu.dma_semaphore, #tpu.memory_space<semaphore_mem>>)
      %c2_i32_24 = arith.constant 2 : i32
      %47 = arith.addi %26, %c2_i32_24 : i32
      %48 = arith.index_cast %47 : i32 to index
      %49 = memref.load %arg2[%48] : memref<32xi32, #tpu.memory_space<smem>>
      %c0_i32_25 = arith.constant 0 : i32
      %50 = arith.addi %c0_i32_25, %c2_i32_24 : i32
      %c0_i32_26 = arith.constant 0 : i32
      %c0_i32_27 = arith.constant 0 : i32
      %51 = tpu.memref_slice %arg3[%49, %c0_i32_27] : memref<32x128xf32, #tpu.memory_space<any>> -> memref<1x128xf32, #tpu.memory_space<any>>
      %52 = tpu.memref_squeeze %51 : memref<1x128xf32, #tpu.memory_space<any>> -> memref<128xf32, #tpu.memory_space<any>>
      %c0_i32_28 = arith.constant 0 : i32
      %53 = tpu.memref_slice %arg6[%50, %c0_i32_28] : memref<16x128xf32, #tpu.memory_space<vmem>> -> memref<1x128xf32, #tpu.memory_space<vmem>>
      %54 = tpu.memref_squeeze %53 : memref<1x128xf32, #tpu.memory_space<vmem>> -> memref<128xf32, #tpu.memory_space<vmem>>
      %55 = tpu.memref_slice %arg7[%c0_i32_26] : memref<2x!tpu.dma_semaphore, #tpu.memory_space<semaphore_mem>> -> memref<1x!tpu.dma_semaphore, #tpu.memory_space<semaphore_mem>>
      %56 = tpu.memref_squeeze %55 : memref<1x!tpu.dma_semaphore, #tpu.memory_space<semaphore_mem>> -> memref<!tpu.dma_semaphore, #tpu.memory_space<semaphore_mem>>
      tpu.enqueue_dma source(%52 : memref<128xf32, #tpu.memory_space<any>>) target(%54 : memref<128xf32, #tpu.memory_space<vmem>>) target_semaphore(%56 : memref<!tpu.dma_semaphore, #tpu.memory_space<semaphore_mem>>)
      %c3_i32 = arith.constant 3 : i32
      %57 = arith.addi %26, %c3_i32 : i32
      %58 = arith.index_cast %57 : i32 to index
      %59 = memref.load %arg2[%58] : memref<32xi32, #tpu.memory_space<smem>>
      %c0_i32_29 = arith.constant 0 : i32
      %60 = arith.addi %c0_i32_29, %c3_i32 : i32
      %c0_i32_30 = arith.constant 0 : i32
      %c0_i32_31 = arith.constant 0 : i32
      %61 = tpu.memref_slice %arg3[%59, %c0_i32_31] : memref<32x128xf32, #tpu.memory_space<any>> -> memref<1x128xf32, #tpu.memory_space<any>>
      %62 = tpu.memref_squeeze %61 : memref<1x128xf32, #tpu.memory_space<any>> -> memref<128xf32, #tpu.memory_space<any>>
      %c0_i32_32 = arith.constant 0 : i32
      %63 = tpu.memref_slice %arg6[%60, %c0_i32_32] : memref<16x128xf32, #tpu.memory_space<vmem>> -> memref<1x128xf32, #tpu.memory_space<vmem>>
      %64 = tpu.memref_squeeze %63 : memref<1x128xf32, #tpu.memory_space<vmem>> -> memref<128xf32, #tpu.memory_space<vmem>>
      %65 = tpu.memref_slice %arg7[%c0_i32_30] : memref<2x!tpu.dma_semaphore, #tpu.memory_space<semaphore_mem>> -> memref<1x!tpu.dma_semaphore, #tpu.memory_space<semaphore_mem>>
      %66 = tpu.memref_squeeze %65 : memref<1x!tpu.dma_semaphore, #tpu.memory_space<semaphore_mem>> -> memref<!tpu.dma_semaphore, #tpu.memory_space<semaphore_mem>>
      tpu.enqueue_dma source(%62 : memref<128xf32, #tpu.memory_space<any>>) target(%64 : memref<128xf32, #tpu.memory_space<vmem>>) target_semaphore(%66 : memref<!tpu.dma_semaphore, #tpu.memory_space<semaphore_mem>>)
      %c4_i32 = arith.constant 4 : i32
      %67 = arith.addi %26, %c4_i32 : i32
      %68 = arith.index_cast %67 : i32 to index
      %69 = memref.load %arg2[%68] : memref<32xi32, #tpu.memory_space<smem>>
      %c0_i32_33 = arith.constant 0 : i32
      %70 = arith.addi %c0_i32_33, %c4_i32 : i32
      %c0_i32_34 = arith.constant 0 : i32
      %c0_i32_35 = arith.constant 0 : i32
      %71 = tpu.memref_slice %arg3[%69, %c0_i32_35] : memref<32x128xf32, #tpu.memory_space<any>> -> memref<1x128xf32, #tpu.memory_space<any>>
      %72 = tpu.memref_squeeze %71 : memref<1x128xf32, #tpu.memory_space<any>> -> memref<128xf32, #tpu.memory_space<any>>
      %c0_i32_36 = arith.constant 0 : i32
      %73 = tpu.memref_slice %arg6[%70, %c0_i32_36] : memref<16x128xf32, #tpu.memory_space<vmem>> -> memref<1x128xf32, #tpu.memory_space<vmem>>
      %74 = tpu.memref_squeeze %73 : memref<1x128xf32, #tpu.memory_space<vmem>> -> memref<128xf32, #tpu.memory_space<vmem>>
      %75 = tpu.memref_slice %arg7[%c0_i32_34] : memref<2x!tpu.dma_semaphore, #tpu.memory_space<semaphore_mem>> -> memref<1x!tpu.dma_semaphore, #tpu.memory_space<semaphore_mem>>
      %76 = tpu.memref_squeeze %75 : memref<1x!tpu.dma_semaphore, #tpu.memory_space<semaphore_mem>> -> memref<!tpu.dma_semaphore, #tpu.memory_space<semaphore_mem>>
      tpu.enqueue_dma source(%72 : memref<128xf32, #tpu.memory_space<any>>) target(%74 : memref<128xf32, #tpu.memory_space<vmem>>) target_semaphore(%76 : memref<!tpu.dma_semaphore, #tpu.memory_space<semaphore_mem>>)
      %c5_i32 = arith.constant 5 : i32
      %77 = arith.addi %26, %c5_i32 : i32
      %78 = arith.index_cast %77 : i32 to index
      %79 = memref.load %arg2[%78] : memref<32xi32, #tpu.memory_space<smem>>
      %c0_i32_37 = arith.constant 0 : i32
      %80 = arith.addi %c0_i32_37, %c5_i32 : i32
      %c0_i32_38 = arith.constant 0 : i32
      %c0_i32_39 = arith.constant 0 : i32
      %81 = tpu.memref_slice %arg3[%79, %c0_i32_39] : memref<32x128xf32, #tpu.memory_space<any>> -> memref<1x128xf32, #tpu.memory_space<any>>
      %82 = tpu.memref_squeeze %81 : memref<1x128xf32, #tpu.memory_space<any>> -> memref<128xf32, #tpu.memory_space<any>>
      %c0_i32_40 = arith.constant 0 : i32
      %83 = tpu.memref_slice %arg6[%80, %c0_i32_40] : memref<16x128xf32, #tpu.memory_space<vmem>> -> memref<1x128xf32, #tpu.memory_space<vmem>>
      %84 = tpu.memref_squeeze %83 : memref<1x128xf32, #tpu.memory_space<vmem>> -> memref<128xf32, #tpu.memory_space<vmem>>
      %85 = tpu.memref_slice %arg7[%c0_i32_38] : memref<2x!tpu.dma_semaphore, #tpu.memory_space<semaphore_mem>> -> memref<1x!tpu.dma_semaphore, #tpu.memory_space<semaphore_mem>>
      %86 = tpu.memref_squeeze %85 : memref<1x!tpu.dma_semaphore, #tpu.memory_space<semaphore_mem>> -> memref<!tpu.dma_semaphore, #tpu.memory_space<semaphore_mem>>
      tpu.enqueue_dma source(%82 : memref<128xf32, #tpu.memory_space<any>>) target(%84 : memref<128xf32, #tpu.memory_space<vmem>>) target_semaphore(%86 : memref<!tpu.dma_semaphore, #tpu.memory_space<semaphore_mem>>)
      %c6_i32 = arith.constant 6 : i32
      %87 = arith.addi %26, %c6_i32 : i32
      %88 = arith.index_cast %87 : i32 to index
      %89 = memref.load %arg2[%88] : memref<32xi32, #tpu.memory_space<smem>>
      %c0_i32_41 = arith.constant 0 : i32
      %90 = arith.addi %c0_i32_41, %c6_i32 : i32
      %c0_i32_42 = arith.constant 0 : i32
      %c0_i32_43 = arith.constant 0 : i32
      %91 = tpu.memref_slice %arg3[%89, %c0_i32_43] : memref<32x128xf32, #tpu.memory_space<any>> -> memref<1x128xf32, #tpu.memory_space<any>>
      %92 = tpu.memref_squeeze %91 : memref<1x128xf32, #tpu.memory_space<any>> -> memref<128xf32, #tpu.memory_space<any>>
      %c0_i32_44 = arith.constant 0 : i32
      %93 = tpu.memref_slice %arg6[%90, %c0_i32_44] : memref<16x128xf32, #tpu.memory_space<vmem>> -> memref<1x128xf32, #tpu.memory_space<vmem>>
      %94 = tpu.memref_squeeze %93 : memref<1x128xf32, #tpu.memory_space<vmem>> -> memref<128xf32, #tpu.memory_space<vmem>>
      %95 = tpu.memref_slice %arg7[%c0_i32_42] : memref<2x!tpu.dma_semaphore, #tpu.memory_space<semaphore_mem>> -> memref<1x!tpu.dma_semaphore, #tpu.memory_space<semaphore_mem>>
      %96 = tpu.memref_squeeze %95 : memref<1x!tpu.dma_semaphore, #tpu.memory_space<semaphore_mem>> -> memref<!tpu.dma_semaphore, #tpu.memory_space<semaphore_mem>>
      tpu.enqueue_dma source(%92 : memref<128xf32, #tpu.memory_space<any>>) target(%94 : memref<128xf32, #tpu.memory_space<vmem>>) target_semaphore(%96 : memref<!tpu.dma_semaphore, #tpu.memory_space<semaphore_mem>>)
      %c7_i32 = arith.constant 7 : i32
      %97 = arith.addi %26, %c7_i32 : i32
      %98 = arith.index_cast %97 : i32 to index
      %99 = memref.load %arg2[%98] : memref<32xi32, #tpu.memory_space<smem>>
      %c0_i32_45 = arith.constant 0 : i32
      %100 = arith.addi %c0_i32_45, %c7_i32 : i32
      %c0_i32_46 = arith.constant 0 : i32
      %c0_i32_47 = arith.constant 0 : i32
      %101 = tpu.memref_slice %arg3[%99, %c0_i32_47] : memref<32x128xf32, #tpu.memory_space<any>> -> memref<1x128xf32, #tpu.memory_space<any>>
      %102 = tpu.memref_squeeze %101 : memref<1x128xf32, #tpu.memory_space<any>> -> memref<128xf32, #tpu.memory_space<any>>
      %c0_i32_48 = arith.constant 0 : i32
      %103 = tpu.memref_slice %arg6[%100, %c0_i32_48] : memref<16x128xf32, #tpu.memory_space<vmem>> -> memref<1x128xf32, #tpu.memory_space<vmem>>
      %104 = tpu.memref_squeeze %103 : memref<1x128xf32, #tpu.memory_space<vmem>> -> memref<128xf32, #tpu.memory_space<vmem>>
      %105 = tpu.memref_slice %arg7[%c0_i32_46] : memref<2x!tpu.dma_semaphore, #tpu.memory_space<semaphore_mem>> -> memref<1x!tpu.dma_semaphore, #tpu.memory_space<semaphore_mem>>
      %106 = tpu.memref_squeeze %105 : memref<1x!tpu.dma_semaphore, #tpu.memory_space<semaphore_mem>> -> memref<!tpu.dma_semaphore, #tpu.memory_space<semaphore_mem>>
      tpu.enqueue_dma source(%102 : memref<128xf32, #tpu.memory_space<any>>) target(%104 : memref<128xf32, #tpu.memory_space<vmem>>) target_semaphore(%106 : memref<!tpu.dma_semaphore, #tpu.memory_space<semaphore_mem>>)
      %c8_i32_49 = arith.constant 8 : i32
    } else {
    }
    %c1_i32_1 = arith.constant 1 : i32
    %4 = arith.addi %arg1, %c1_i32_1 : i32
    %c2_i32 = arith.constant 2 : i32
    %5 = arith.cmpi slt, %4, %c2_i32 : i32
    %6 = arith.extui %5 : i1 to i32
    %c0_i32_2 = arith.constant 0 : i32
    %7 = arith.cmpi ne, %6, %c0_i32_2 : i32
    scf.if %7 {
      %c1_i32_13 = arith.constant 1 : i32
      %25 = arith.addi %arg1, %c1_i32_13 : i32
      %c1_i32_14 = arith.constant 1 : i32
      %26 = arith.addi %arg1, %c1_i32_14 : i32
      %c1_i32_15 = arith.constant 1 : i32
      %27 = arith.andi %26, %c1_i32_15 : i32
      %c16_i32 = arith.constant 16 : i32
      %28 = arith.muli %arg0, %c16_i32 : i32
      %c8_i32_16 = arith.constant 8 : i32
      %29 = arith.muli %25, %c8_i32_16 : i32
      %30 = arith.addi %28, %29 : i32
      %c8_i32_17 = arith.constant 8 : i32
      %31 = arith.muli %27, %c8_i32_17 : i32
      %c0_i32_18 = arith.constant 0 : i32
      %32 = arith.addi %30, %c0_i32_18 : i32
      %33 = arith.index_cast %32 : i32 to index
      %34 = memref.load %arg2[%33] : memref<32xi32, #tpu.memory_space<smem>>
      %35 = arith.addi %31, %c0_i32_18 : i32
      %c0_i32_19 = arith.constant 0 : i32
      %36 = tpu.memref_slice %arg3[%34, %c0_i32_19] : memref<32x128xf32, #tpu.memory_space<any>> -> memref<1x128xf32, #tpu.memory_space<any>>
      %37 = tpu.memref_squeeze %36 : memref<1x128xf32, #tpu.memory_space<any>> -> memref<128xf32, #tpu.memory_space<any>>
      %c0_i32_20 = arith.constant 0 : i32
      %38 = tpu.memref_slice %arg6[%35, %c0_i32_20] : memref<16x128xf32, #tpu.memory_space<vmem>> -> memref<1x128xf32, #tpu.memory_space<vmem>>
      %39 = tpu.memref_squeeze %38 : memref<1x128xf32, #tpu.memory_space<vmem>> -> memref<128xf32, #tpu.memory_space<vmem>>
      %40 = tpu.memref_slice %arg7[%27] : memref<2x!tpu.dma_semaphore, #tpu.memory_space<semaphore_mem>> -> memref<1x!tpu.dma_semaphore, #tpu.memory_space<semaphore_mem>>
      %41 = tpu.memref_squeeze %40 : memref<1x!tpu.dma_semaphore, #tpu.memory_space<semaphore_mem>> -> memref<!tpu.dma_semaphore, #tpu.memory_space<semaphore_mem>>
      tpu.enqueue_dma source(%37 : memref<128xf32, #tpu.memory_space<any>>) target(%39 : memref<128xf32, #tpu.memory_space<vmem>>) target_semaphore(%41 : memref<!tpu.dma_semaphore, #tpu.memory_space<semaphore_mem>>)
      %c1_i32_21 = arith.constant 1 : i32
      %42 = arith.addi %30, %c1_i32_21 : i32
      %43 = arith.index_cast %42 : i32 to index
      %44 = memref.load %arg2[%43] : memref<32xi32, #tpu.memory_space<smem>>
      %45 = arith.addi %31, %c1_i32_21 : i32
      %c0_i32_22 = arith.constant 0 : i32
      %46 = tpu.memref_slice %arg3[%44, %c0_i32_22] : memref<32x128xf32, #tpu.memory_space<any>> -> memref<1x128xf32, #tpu.memory_space<any>>
      %47 = tpu.memref_squeeze %46 : memref<1x128xf32, #tpu.memory_space<any>> -> memref<128xf32, #tpu.memory_space<any>>
      %c0_i32_23 = arith.constant 0 : i32
      %48 = tpu.memref_slice %arg6[%45, %c0_i32_23] : memref<16x128xf32, #tpu.memory_space<vmem>> -> memref<1x128xf32, #tpu.memory_space<vmem>>
      %49 = tpu.memref_squeeze %48 : memref<1x128xf32, #tpu.memory_space<vmem>> -> memref<128xf32, #tpu.memory_space<vmem>>
      %50 = tpu.memref_slice %arg7[%27] : memref<2x!tpu.dma_semaphore, #tpu.memory_space<semaphore_mem>> -> memref<1x!tpu.dma_semaphore, #tpu.memory_space<semaphore_mem>>
      %51 = tpu.memref_squeeze %50 : memref<1x!tpu.dma_semaphore, #tpu.memory_space<semaphore_mem>> -> memref<!tpu.dma_semaphore, #tpu.memory_space<semaphore_mem>>
      tpu.enqueue_dma source(%47 : memref<128xf32, #tpu.memory_space<any>>) target(%49 : memref<128xf32, #tpu.memory_space<vmem>>) target_semaphore(%51 : memref<!tpu.dma_semaphore, #tpu.memory_space<semaphore_mem>>)
      %c2_i32_24 = arith.constant 2 : i32
      %52 = arith.addi %30, %c2_i32_24 : i32
      %53 = arith.index_cast %52 : i32 to index
      %54 = memref.load %arg2[%53] : memref<32xi32, #tpu.memory_space<smem>>
      %55 = arith.addi %31, %c2_i32_24 : i32
      %c0_i32_25 = arith.constant 0 : i32
      %56 = tpu.memref_slice %arg3[%54, %c0_i32_25] : memref<32x128xf32, #tpu.memory_space<any>> -> memref<1x128xf32, #tpu.memory_space<any>>
      %57 = tpu.memref_squeeze %56 : memref<1x128xf32, #tpu.memory_space<any>> -> memref<128xf32, #tpu.memory_space<any>>
      %c0_i32_26 = arith.constant 0 : i32
      %58 = tpu.memref_slice %arg6[%55, %c0_i32_26] : memref<16x128xf32, #tpu.memory_space<vmem>> -> memref<1x128xf32, #tpu.memory_space<vmem>>
      %59 = tpu.memref_squeeze %58 : memref<1x128xf32, #tpu.memory_space<vmem>> -> memref<128xf32, #tpu.memory_space<vmem>>
      %60 = tpu.memref_slice %arg7[%27] : memref<2x!tpu.dma_semaphore, #tpu.memory_space<semaphore_mem>> -> memref<1x!tpu.dma_semaphore, #tpu.memory_space<semaphore_mem>>
      %61 = tpu.memref_squeeze %60 : memref<1x!tpu.dma_semaphore, #tpu.memory_space<semaphore_mem>> -> memref<!tpu.dma_semaphore, #tpu.memory_space<semaphore_mem>>
      tpu.enqueue_dma source(%57 : memref<128xf32, #tpu.memory_space<any>>) target(%59 : memref<128xf32, #tpu.memory_space<vmem>>) target_semaphore(%61 : memref<!tpu.dma_semaphore, #tpu.memory_space<semaphore_mem>>)
      %c3_i32 = arith.constant 3 : i32
      %62 = arith.addi %30, %c3_i32 : i32
      %63 = arith.index_cast %62 : i32 to index
      %64 = memref.load %arg2[%63] : memref<32xi32, #tpu.memory_space<smem>>
      %65 = arith.addi %31, %c3_i32 : i32
      %c0_i32_27 = arith.constant 0 : i32
      %66 = tpu.memref_slice %arg3[%64, %c0_i32_27] : memref<32x128xf32, #tpu.memory_space<any>> -> memref<1x128xf32, #tpu.memory_space<any>>
      %67 = tpu.memref_squeeze %66 : memref<1x128xf32, #tpu.memory_space<any>> -> memref<128xf32, #tpu.memory_space<any>>
      %c0_i32_28 = arith.constant 0 : i32
      %68 = tpu.memref_slice %arg6[%65, %c0_i32_28] : memref<16x128xf32, #tpu.memory_space<vmem>> -> memref<1x128xf32, #tpu.memory_space<vmem>>
      %69 = tpu.memref_squeeze %68 : memref<1x128xf32, #tpu.memory_space<vmem>> -> memref<128xf32, #tpu.memory_space<vmem>>
      %70 = tpu.memref_slice %arg7[%27] : memref<2x!tpu.dma_semaphore, #tpu.memory_space<semaphore_mem>> -> memref<1x!tpu.dma_semaphore, #tpu.memory_space<semaphore_mem>>
      %71 = tpu.memref_squeeze %70 : memref<1x!tpu.dma_semaphore, #tpu.memory_space<semaphore_mem>> -> memref<!tpu.dma_semaphore, #tpu.memory_space<semaphore_mem>>
      tpu.enqueue_dma source(%67 : memref<128xf32, #tpu.memory_space<any>>) target(%69 : memref<128xf32, #tpu.memory_space<vmem>>) target_semaphore(%71 : memref<!tpu.dma_semaphore, #tpu.memory_space<semaphore_mem>>)
      %c4_i32 = arith.constant 4 : i32
      %72 = arith.addi %30, %c4_i32 : i32
      %73 = arith.index_cast %72 : i32 to index
      %74 = memref.load %arg2[%73] : memref<32xi32, #tpu.memory_space<smem>>
      %75 = arith.addi %31, %c4_i32 : i32
      %c0_i32_29 = arith.constant 0 : i32
      %76 = tpu.memref_slice %arg3[%74, %c0_i32_29] : memref<32x128xf32, #tpu.memory_space<any>> -> memref<1x128xf32, #tpu.memory_space<any>>
      %77 = tpu.memref_squeeze %76 : memref<1x128xf32, #tpu.memory_space<any>> -> memref<128xf32, #tpu.memory_space<any>>
      %c0_i32_30 = arith.constant 0 : i32
      %78 = tpu.memref_slice %arg6[%75, %c0_i32_30] : memref<16x128xf32, #tpu.memory_space<vmem>> -> memref<1x128xf32, #tpu.memory_space<vmem>>
      %79 = tpu.memref_squeeze %78 : memref<1x128xf32, #tpu.memory_space<vmem>> -> memref<128xf32, #tpu.memory_space<vmem>>
      %80 = tpu.memref_slice %arg7[%27] : memref<2x!tpu.dma_semaphore, #tpu.memory_space<semaphore_mem>> -> memref<1x!tpu.dma_semaphore, #tpu.memory_space<semaphore_mem>>
      %81 = tpu.memref_squeeze %80 : memref<1x!tpu.dma_semaphore, #tpu.memory_space<semaphore_mem>> -> memref<!tpu.dma_semaphore, #tpu.memory_space<semaphore_mem>>
      tpu.enqueue_dma source(%77 : memref<128xf32, #tpu.memory_space<any>>) target(%79 : memref<128xf32, #tpu.memory_space<vmem>>) target_semaphore(%81 : memref<!tpu.dma_semaphore, #tpu.memory_space<semaphore_mem>>)
      %c5_i32 = arith.constant 5 : i32
      %82 = arith.addi %30, %c5_i32 : i32
      %83 = arith.index_cast %82 : i32 to index
      %84 = memref.load %arg2[%83] : memref<32xi32, #tpu.memory_space<smem>>
      %85 = arith.addi %31, %c5_i32 : i32
      %c0_i32_31 = arith.constant 0 : i32
      %86 = tpu.memref_slice %arg3[%84, %c0_i32_31] : memref<32x128xf32, #tpu.memory_space<any>> -> memref<1x128xf32, #tpu.memory_space<any>>
      %87 = tpu.memref_squeeze %86 : memref<1x128xf32, #tpu.memory_space<any>> -> memref<128xf32, #tpu.memory_space<any>>
      %c0_i32_32 = arith.constant 0 : i32
      %88 = tpu.memref_slice %arg6[%85, %c0_i32_32] : memref<16x128xf32, #tpu.memory_space<vmem>> -> memref<1x128xf32, #tpu.memory_space<vmem>>
      %89 = tpu.memref_squeeze %88 : memref<1x128xf32, #tpu.memory_space<vmem>> -> memref<128xf32, #tpu.memory_space<vmem>>
      %90 = tpu.memref_slice %arg7[%27] : memref<2x!tpu.dma_semaphore, #tpu.memory_space<semaphore_mem>> -> memref<1x!tpu.dma_semaphore, #tpu.memory_space<semaphore_mem>>
      %91 = tpu.memref_squeeze %90 : memref<1x!tpu.dma_semaphore, #tpu.memory_space<semaphore_mem>> -> memref<!tpu.dma_semaphore, #tpu.memory_space<semaphore_mem>>
      tpu.enqueue_dma source(%87 : memref<128xf32, #tpu.memory_space<any>>) target(%89 : memref<128xf32, #tpu.memory_space<vmem>>) target_semaphore(%91 : memref<!tpu.dma_semaphore, #tpu.memory_space<semaphore_mem>>)
      %c6_i32 = arith.constant 6 : i32
      %92 = arith.addi %30, %c6_i32 : i32
      %93 = arith.index_cast %92 : i32 to index
      %94 = memref.load %arg2[%93] : memref<32xi32, #tpu.memory_space<smem>>
      %95 = arith.addi %31, %c6_i32 : i32
      %c0_i32_33 = arith.constant 0 : i32
      %96 = tpu.memref_slice %arg3[%94, %c0_i32_33] : memref<32x128xf32, #tpu.memory_space<any>> -> memref<1x128xf32, #tpu.memory_space<any>>
      %97 = tpu.memref_squeeze %96 : memref<1x128xf32, #tpu.memory_space<any>> -> memref<128xf32, #tpu.memory_space<any>>
      %c0_i32_34 = arith.constant 0 : i32
      %98 = tpu.memref_slice %arg6[%95, %c0_i32_34] : memref<16x128xf32, #tpu.memory_space<vmem>> -> memref<1x128xf32, #tpu.memory_space<vmem>>
      %99 = tpu.memref_squeeze %98 : memref<1x128xf32, #tpu.memory_space<vmem>> -> memref<128xf32, #tpu.memory_space<vmem>>
      %100 = tpu.memref_slice %arg7[%27] : memref<2x!tpu.dma_semaphore, #tpu.memory_space<semaphore_mem>> -> memref<1x!tpu.dma_semaphore, #tpu.memory_space<semaphore_mem>>
      %101 = tpu.memref_squeeze %100 : memref<1x!tpu.dma_semaphore, #tpu.memory_space<semaphore_mem>> -> memref<!tpu.dma_semaphore, #tpu.memory_space<semaphore_mem>>
      tpu.enqueue_dma source(%97 : memref<128xf32, #tpu.memory_space<any>>) target(%99 : memref<128xf32, #tpu.memory_space<vmem>>) target_semaphore(%101 : memref<!tpu.dma_semaphore, #tpu.memory_space<semaphore_mem>>)
      %c7_i32 = arith.constant 7 : i32
      %102 = arith.addi %30, %c7_i32 : i32
      %103 = arith.index_cast %102 : i32 to index
      %104 = memref.load %arg2[%103] : memref<32xi32, #tpu.memory_space<smem>>
      %105 = arith.addi %31, %c7_i32 : i32
      %c0_i32_35 = arith.constant 0 : i32
      %106 = tpu.memref_slice %arg3[%104, %c0_i32_35] : memref<32x128xf32, #tpu.memory_space<any>> -> memref<1x128xf32, #tpu.memory_space<any>>
      %107 = tpu.memref_squeeze %106 : memref<1x128xf32, #tpu.memory_space<any>> -> memref<128xf32, #tpu.memory_space<any>>
      %c0_i32_36 = arith.constant 0 : i32
      %108 = tpu.memref_slice %arg6[%105, %c0_i32_36] : memref<16x128xf32, #tpu.memory_space<vmem>> -> memref<1x128xf32, #tpu.memory_space<vmem>>
      %109 = tpu.memref_squeeze %108 : memref<1x128xf32, #tpu.memory_space<vmem>> -> memref<128xf32, #tpu.memory_space<vmem>>
      %110 = tpu.memref_slice %arg7[%27] : memref<2x!tpu.dma_semaphore, #tpu.memory_space<semaphore_mem>> -> memref<1x!tpu.dma_semaphore, #tpu.memory_space<semaphore_mem>>
      %111 = tpu.memref_squeeze %110 : memref<1x!tpu.dma_semaphore, #tpu.memory_space<semaphore_mem>> -> memref<!tpu.dma_semaphore, #tpu.memory_space<semaphore_mem>>
      tpu.enqueue_dma source(%107 : memref<128xf32, #tpu.memory_space<any>>) target(%109 : memref<128xf32, #tpu.memory_space<vmem>>) target_semaphore(%111 : memref<!tpu.dma_semaphore, #tpu.memory_space<semaphore_mem>>)
      %c8_i32_37 = arith.constant 8 : i32
    } else {
    }
    %c8_i32 = arith.constant 8 : i32
    %8 = arith.muli %0, %c8_i32 : i32
    %9 = tpu.assume_multiple %8, 8 : i32
    %c1_i32_3 = arith.constant 1 : i32
    %10 = arith.subi %c1_i32_3, %0 : i32
    %c8_i32_4 = arith.constant 8 : i32
    %11 = arith.muli %10, %c8_i32_4 : i32
    %12 = tpu.assume_multiple %11, 8 : i32
    %c0_i32_5 = arith.constant 0 : i32
    %13 = tpu.memref_slice %arg6[%12, %c0_i32_5] : memref<16x128xf32, #tpu.memory_space<vmem>> -> memref<8x128xf32, #tpu.memory_space<vmem>>
    %c0_i32_6 = arith.constant 0 : i32
    %14 = tpu.memref_slice %arg6[%9, %c0_i32_6] : memref<16x128xf32, #tpu.memory_space<vmem>> -> memref<8x128xf32, #tpu.memory_space<vmem>>
    %15 = tpu.memref_slice %arg7[%0] : memref<2x!tpu.dma_semaphore, #tpu.memory_space<semaphore_mem>> -> memref<1x!tpu.dma_semaphore, #tpu.memory_space<semaphore_mem>>
    %16 = tpu.memref_squeeze %15 : memref<1x!tpu.dma_semaphore, #tpu.memory_space<semaphore_mem>> -> memref<!tpu.dma_semaphore, #tpu.memory_space<semaphore_mem>>
    tpu.wait_dma2 semaphore(%16 : memref<!tpu.dma_semaphore, #tpu.memory_space<semaphore_mem>>) src(%13 : memref<8x128xf32, #tpu.memory_space<vmem>>) dst(%14 : memref<8x128xf32, #tpu.memory_space<vmem>>)
    %17 = arith.index_cast %9 : i32 to index
    %c0 = arith.constant 0 : index
    %18 = vector.load %arg6[%17, %c0] : memref<16x128xf32, #tpu.memory_space<vmem>>, vector<8x128xf32>
    %c0_7 = arith.constant 0 : index
    %c0_8 = arith.constant 0 : index
    %c0_9 = arith.constant 0 : index
    %19 = vector.load %arg4[%c0_7, %c0_8, %c0_9] : memref<1x8x128xf32, #tpu.memory_space<vmem>>, vector<1x8x128xf32>
    %20 = vector.shape_cast %19 : vector<1x8x128xf32> to vector<8x128xf32>
    %21 = arith.addf %18, %20 : vector<8x128xf32>
    %c0_10 = arith.constant 0 : index
    %c0_11 = arith.constant 0 : index
    %c0_12 = arith.constant 0 : index
    %22 = vector.load %arg5[%c0_10, %c0_11, %c0_12] : memref<1x8x128xf32, #tpu.memory_space<vmem>>, vector<1x8x128xf32>
    %23 = vector.shape_cast %22 : vector<1x8x128xf32> to vector<8x128xf32>
    %24 = vector.shape_cast %21 : vector<8x128xf32> to vector<1x8x128xf32>
    tpu.vector_store %arg5[%c0_10, %c0_11, %c0_12], %24 {strides = array<i32>} : memref<1x8x128xf32, #tpu.memory_space<vmem>>, vector<1x8x128xf32>,
    return
  }
  func.func @transform_1(%arg0: i32, %arg1: i32, %arg2: memref<32xi32, #tpu.memory_space<smem>>) -> (i32, i32, i32) {
    %c0_i32 = arith.constant 0 : i32
    %c0_i32_0 = arith.constant 0 : i32
    %c0_i32_1 = arith.constant 0 : i32
    return %c0_i32, %arg1, %c0_i32_0 : i32, i32, i32
  }
  func.func @transform_2(%arg0: i32, %arg1: i32, %arg2: memref<32xi32, #tpu.memory_space<smem>>) -> (i32, i32, i32) {
    %c0_i32 = arith.constant 0 : i32
    %c0_i32_0 = arith.constant 0 : i32
    return %arg0, %arg1, %c0_i32 : i32, i32, i32
  }
}

</mosaic_0001>

<bundles_post_ra>
// kernel: tpu_custom_call.1
= control target key start
LH: loop header
LB: loop body
LE: loop exit
PB: predicated region body
PF: predicated region fallthrough
CT: control target
= control target key end

     0   :  { %s2222_s0 = inlined_call_operand.hbm [shape: s32[32], index: 0, kind: input, shape index: {}]   ;;  %s2223_s1 = inlined_call_operand.hbm [shape: f32[32,128], index: 1, kind: input, shape index: {}]   ;;  %s2224_s2 = inlined_call_operand.hbm [shape: f32[1,16,128], index: 2, kind: input, shape index: {}]   ;;  %s2225_s3 = inlined_call_operand.hbm [shape: f32[2,16,128], index: 3, kind: output, shape index: {}]  }
   0x1   :  { %2240 = sst [smem:[#allocation76_spill]] %s2224_s2  ;;  %s823_s14 = scalar_lea.hbm %s2222_s0, 16 }
   0x2   :  { %p824_p0 = scmp.ne.s32.totalorder %s2222_s0, %s823_s14  ;;  %p827_p1 = scmp.lt.u32.totalorder %s823_s14, %s2222_s0 }
   0x4   :  { %p829_p2 = pnand %p827_p1, %p824_p0 }
   0x6   :  { %832 = shalt.err (!%p829_p2)  }
   0x7   :  { %s1439_s19 = smov [#allocation5]  }
   0x8   :  { %9 = dma.hbm_to_smem %s2222_s0, 16, %s1439_s19, [#allocation4] }
   0x9   :  { %1383 = dma.done.wait [#allocation4], 16 }
   0xa   :  { %1384 = vsyncadd [#allocation4], 4294967280 }
   0xb   :  { %11 = sfence }
   0xc   :  { %12 = vsyncpa [#allocation7], 0 }
   0xd   :  { %14 = vsyncpa [#allocation7 + $0x1], 0 }
   0xe   :  { %15 = vsyncpa [#allocation8], 0 }
   0xf   :  { %17 = vsyncpa [#allocation8 + $0x1], 0  ;;  %s1482_s22 = smov 0   ;;  %s1484_s23 = smov 0  }
  0x10   :  { %s1486_s24 = smov 0   ;;  %s1488_s25 = smov 0  }
  0x11   :  { %s1490_s26 = smov 0   ;;  %s1492_s27 = smov 0  }
  0x12   :  { %s1494_s0 = smov 0   ;;  %s1496_s28 = smov 0  }
  0x13   :  { %s1498_s29 = smov 0   ;;  %s1500_s30 = smov 0  }
  0x14   :  { %s1502_s4 = smov 0  }
  0x15 LB: > { %2241 = sst [smem:[#allocation64_spill]] %s1397_s22  ;;  %s612_s5 = sadd.s32 4294967295, %s1437_s4   ;;  %s1437_s4 = sphi %s1502_s4, %s23_s4   ;;  %s1433_s30 = sphi %s1500_s30, %s2281_s30   ;;  %s1429_s29 = sphi %s1498_s29, %s2280_s29   ;;  %s1425_s28 = sphi %s1496_s28, %s2279_s28   ;;  %s1421_s0 = sphi %s1494_s0, %s2278_s0   ;;  %s1417_s27 = sphi %s1492_s27, %s2277_s27   ;;  %s1413_s26 = sphi %s1490_s26, %s2276_s26   ;;  %s1409_s25 = sphi %s1488_s25, %s2275_s25   ;;  %s1405_s24 = sphi %s1486_s24, %s2274_s24   ;;  %s1401_s23 = sphi %s1484_s23, %s2283_s23   ;;  %s1397_s22 = sphi %s1482_s22, %s2282_s22  }
  0x16   : > { %2242 = sst [smem:[#allocation65_spill]] %s1405_s24  ;;  %s613_s6 = sadd.s32 4294967294, %s1437_s4  }
  0x17   : > { %2243 = sst [smem:[#allocation66_spill]] %s1413_s26  ;;  %s32_s7 = sadd.s32 1, %s1429_s29 }
  0x18   : > { %2244 = sst [smem:[#allocation67_spill]] %s1417_s27  ;;  %s35_s8 = sadd.s32 1, %s1433_s30 }
  0x19   : > { %2245 = sst [smem:[#allocation68_spill]] %s1429_s29  ;;  %p33_p3 = scmp.ge.s32.totalorder %s32_s7, 2 }
  0x1a   : > { %2246 = sst [smem:[#allocation69_spill]] %s1433_s30  ;;  %s42_s9 = sadd.s32 1, %s1417_s27 }
  0x1b   : > { %2247 = sst [smem:[#allocation70_spill]] %s1437_s4  ;;  %p49_p4 = scmp.ne.s32.totalorder %s1417_s27, %s1413_s26 }
  0x1c   : > { %p50_p5 = scmp.eq.s32.totalorder %s1437_s4, 0  ;;  %s2285_s7 = smov (%p33_p3, %s32_s7), 0 }
  0x1d   : > { %2248 = sst [smem:[#allocation71_spill]] %s2285_s7  ;;  %s2287_s8 = smov (!%p33_p3, %s35_s8), %s1433_s30 }
  0x1e   : > { %s39_s10 = ssub.s32 %s1429_s29, %s2285_s7  ;;  %p1548_p6 = por %p50_p5, %p49_p4 }
  0x1f   : > { %p37_p7 = scmp.ge.s32.totalorder %s2287_s8, 2  ;;  %p40_p8 = scmp.eq.s32.totalorder %s39_s10, 0 }
  0x20   : > { %p55_p9 = scmp.ne.s32.totalorder %s1413_s26, %s1409_s25  ;;  %p56_p10 = scmp.eq.s32.totalorder %s612_s5, 0 }
  0x21   : > { %s2289_s8 = smov (%p37_p7, %s2287_s8), 0  ;;  %s70_s16 = sadd.s32 1, %s1405_s24 }
  0x22   : > { %2250 = sst [smem:[#allocation72_spill]] %s2289_s8  ;;  %p1558_p11 = por %p56_p10, %p55_p9 }
  0x23   : > { %s1556_s12 = scalar_select %p40_p8, %s1417_s27, %s42_s9  }
  0x24   : > { %s65_s14 = ssub.s32 %s1433_s30, %s2289_s8  ;;  %p80_p13 = scmp.ne.s32.totalorder %s1405_s24, %s1401_s23 }
  0x25   : > { %2251 = sst [smem:[#allocation73_spill]] %s1556_s12  ;;  %s67_s15 = sor.u32 %s65_s14, %s39_s10 }
  0x26   : > { %p68_p12 = scmp.eq.s32.totalorder %s67_s15, 0  ;;  %p81_p0 = scmp.eq.s32.totalorder %s612_s5, 3 }
  0x27   : > { %p86_p1 = scmp.ne.s32.totalorder %s1401_s23, %s1397_s22  ;;  %p87_p3 = scmp.eq.s32.totalorder %s613_s6, 3 }
  0x28   : > { %s1570_s17 = scalar_select %p68_p12, %s1405_s24, %s70_s16  }
  0x29   : > { %p1572_p2 = por %p81_p0, %p80_p13  ;;  %p722_p4 = scmp.lt.s32.totalorder %s1437_s4, 4 }
  0x2a   : > { %2253 = sst [smem:[#allocation74_spill]] %s1570_s17  ;;  %p1577_p5 = por %p87_p3, %p86_p1 }
  0x2b   : > { %s2254_s18 = scalar_select %p1572_p2, 1, 0 }
  0x2c   : > { %s2255_s19 = scalar_select %p1577_p5, 1, 0 }
  0x2d   : > { %s107_s20 = sand.u32 1, %s1417_s27   ;;  %s617_s25 = sshll.u32 %s1429_s29, 7 }
  0x2e   : > { %2256 = sst [smem:[#allocation75_spill]] %s2255_s19  ;;  %s616_s21 = sshll.u32 %s107_s20, 3 }
  0x2f   : > { %s2257_s2 = sld [smem:[#allocation76_spill]]  ;;  %s111_s14 = scalar_lea.vmem [#allocation6], %s616_s21 }
  0x30   : > { %s118_s15 = sshll.u32 %s111_s14, 4  ;;  %p1592_p7 = pnand %p722_p4, %p1548_p6  ;;  %s1588_s15 = int_to_ptr.vmem [resolvable:$true] %s118_s15 }
  0x31   : > { %s108_s16 = scalar_lea.sflag [#allocation7], %s107_s20 }
  0x32   : > { %p835_p12 = pneg %p1592_p7 }
  0x35   : > { %s1586_s5 = scalar_lea.hbm %s2257_s2, %s617_s25  ;;  %s838_s11 = scalar_lea.hbm %s2257_s2, 256 }
  0x36   : > { %s833_s25 = scalar_lea.hbm %s1586_s5, 128  ;;  %p839_p6 = scmp.lt.u32.totalorder %s1586_s5, %s2257_s2 }
  0x37   : > { %p834_p10 = scmp.ne.s32.totalorder %s1586_s5, %s833_s25  ;;  %p840_p1 = scmp.lt.u32.totalorder %s838_s11, %s833_s25 }
  0x38   : > { %p842_p4 = scmp.lt.u32.totalorder %s833_s25, %s1586_s5 }
  0x39   : > { %p836_p13 = pnand %p835_p12, %p834_p10  ;;  %p841_p3 = por %p840_p1, %p839_p6 }
  0x3b   : > { %p837_p0 = pneg %p836_p13  ;;  %p843_p8 = por %p842_p4, %p841_p3 }
  0x3d   : > { %p844_p9 = pnand %p843_p8, %p837_p0 }
  0x3f   : > { %847 = shalt.err (!%p844_p9)
}
  0x40   : > { %s848_s20 = scalar_lea.vmem %s1588_s15, 128  ;;  %s1440_s21 = smov [#allocation6]  }
  0x41   : > { %p849_p10 = scmp.ne.s32.totalorder %s1588_s15, %s848_s20  ;;  %s853_s9 = sshll.u32 %s1440_s21, 4  ;;  %s854_s9 = int_to_ptr.vmem [resolvable:$false] %s853_s9 }
  0x42   : > { %s855_s10 = scalar_lea.vmem %s854_s9, 256  ;;  %p856_p2 = scmp.lt.s32.totalorder %s1588_s15, %s854_s9 }
  0x43   : > { %p851_p13 = pnand %p849_p10, %p835_p12  ;;  %p857_p6 = scmp.lt.s32.totalorder %s855_s10, %s848_s20 }
  0x45   : > { %p852_p5 = pneg %p851_p13  ;;  %p858_p1 = por %p857_p6, %p856_p2 }
  0x47   : > { %p859_p3 = pnand %p858_p1, %p852_p5 }
  0x49   : > { %862 = shalt.err (!%p859_p3)
}
  0x4a   : > { %717 = dma.hbm_to_vmem [thread:$0]  (!%p1592_p7), %s1586_s5, 128, %s1588_s15, %s108_s16  }
  0x4b   : > { %p2259_p8 = scmp.lt.s32.totalorder %s1437_s4, 5  ;;  %p2260_p9 = scmp.ge.s32.totalorder %s1437_s4, 1 }
  0x4d   : > { %p124_p12 = pnand %p2260_p9, %p2259_p8 }
  0x4e   : > { %s129_s25 = sand.u32 (!%p124_p12), 1, %s1413_s26  }
  0x4f   : > { %127 = sbr.rel (%p124_p12) target bundleno = 548 (0x224), region = 24  ;;  %s1628_s11 = sshll.u32 (!%p124_p12), %s129_s25, 3 }
  0x50   : > { %s130_s14 = scalar_lea.sflag (!%p124_p12), [#allocation7], %s129_s25 }
  0x56   : > { %1386 = dma.done.wait (%p1558_p11), %s130_s14, 128  }
  0x57   : > { %1388 = vsyncadd (%p1558_p11), %s130_s14, 4294967168  ;;  %s2227_s5 = sand.u32 1, %s1401_s23   ;;  %p723_p2 = scmp.eq.s32.totalorder %s1421_s0, 0 }
  0x58   : > { %s1638_s15 = sshll.u32 %s2227_s5, 3  ;;  %s1642_s6 = sshll.u32 %s1425_s28, 4 }
  0x59   : > { %s663_s13 = scalar_select %p723_p2, [#allocation5], [#allocation44] }
  0x5a   : > { %s664_s16 = scalar_select %p723_p2, %s1642_s6, 0 }
  0x5b   : > { %s1441_s21 = smov [#allocation2]   ;;  %s172_s10 = sadd.s32 1, %s1642_s6 }
  0x5c   : > { %s168_s9 = sshll.u32 %s1441_s21, 4  ;;  %s158_s25 = sld [smem:[%s663_s13 + %s664_s16]]  ;;  %s1650_s9 = int_to_ptr.vmem [resolvable:$true] %s168_s9 }
  0x5d   : > { %s666_s14 = scalar_select %p723_p2, [#allocation5], [#allocation45] }
  0x5e   : > { %s2291_s10 = smov (!%p723_p2, %s172_s10), 0  ;;  %s1442_s2 = smov [#allocation2 + $0x1]  }
  0x5f   : > { %s1657_s20 = sld [smem:[%s666_s14 + %s2291_s10]]  ;;  %s184_s8 = sshll.u32 %s1442_s2, 4  ;;  %s1659_s8 = int_to_ptr.vmem [resolvable:$true] %s184_s8 }
  0x60   : > { %s1443_s30 = smov [#allocation2 + $0x2]   ;;  %s1671_s2 = scalar_lea.hbm %s2223_s1, 512 }
  0x61   : > { %s200_s29 = sshll.u32 %s1443_s30, 4  ;;  %s1664_s29 = int_to_ptr.vmem [resolvable:$true] %s200_s29 }
  0x62   : > { %s623_s7 = sshll.u32 %s158_s25, 4 }
  0x63   : > { %s160_s13 = scalar_lea.hbm %s2223_s1, %s623_s7 }
  0x64   : > { %s863_s16 = scalar_lea.hbm %s160_s13, 16  ;;  %p868_p0 = scmp.lt.u32.totalorder %s160_s13, %s2223_s1 }
  0x65   : > { %p864_p11 = scmp.ne.s32.totalorder %s160_s13, %s863_s16  ;;  %p869_p4 = scmp.lt.u32.totalorder %s1671_s2, %s863_s16 }
  0x66   : > { %p871_p13 = scmp.lt.u32.totalorder %s863_s16, %s160_s13 }
  0x67   : > { %p865_p5 = pnand %p864_p11, %p723_p2  ;;  %p870_p10 = por %p869_p4, %p868_p0 }
  0x69   : > { %p866_p7 = pneg %p865_p5  ;;  %p872_p6 = por %p871_p13, %p870_p10 }
  0x6b   : > { %p873_p1 = pnand %p872_p6, %p866_p7 }
  0x6d   : > { %876 = shalt.err (!%p873_p1)  }
  0x6e   : > { %s877_s30 = scalar_lea.vmem %s1650_s9, 16  ;;  %s1682_s7 = scalar_lea.vmem %s1650_s9, 256 }
  0x6f   : > { %p878_p3 = scmp.ne.s32.totalorder %s1650_s9, %s877_s30  ;;  %p884_p12 = scmp.lt.s32.totalorder %s1650_s9, %s1650_s9 }
  0x70   : > { %p885_p11 = scmp.lt.s32.totalorder %s1682_s7, %s877_s30 }
  0x71   : > { %p879_p8 = pnand %p878_p3, %p723_p2 }
  0x72   : > { %p886_p5 = por %p885_p11, %p884_p12 }
  0x73   : > { %p880_p9 = pneg %p879_p8 }
  0x75   : > { %p887_p0 = pnand %p886_p5, %p880_p9 }
  0x77   : > { %890 = shalt.err (!%p887_p0)  }
  0x78   : > { %665 = dma.hbm_to_vmem [thread:$0]  (%p723_p2), %s160_s13, 16, %s1650_s9, [#allocation3] }
  0x79   : > { %s669_s12 = scalar_select %p723_p2, [#allocation5], [#allocation46] }
  0x7a   : > { %s624_s5 = sshll.u32 %s1657_s20, 4  ;;  %s204_s21 = sadd.s32 3, %s1642_s6 }
  0x7b   : > { %s175_s14 = scalar_lea.hbm %s2223_s1, %s624_s5 }
  0x7c   : > { %s891_s25 = scalar_lea.hbm %s175_s14, 16  ;;  %p896_p13 = scmp.lt.u32.totalorder %s175_s14, %s2223_s1 }
  0x7d   : > { %p892_p7 = scmp.ne.s32.totalorder %s175_s14, %s891_s25  ;;  %p897_p6 = scmp.lt.u32.totalorder %s1671_s2, %s891_s25 }
  0x7e   : > { %p899_p3 = scmp.lt.u32.totalorder %s891_s25, %s175_s14 }
  0x7f   : > { %p893_p4 = pnand %p892_p7, %p723_p2  ;;  %p898_p1 = por %p897_p6, %p896_p13 }
  0x81   : > { %p894_p10 = pneg %p893_p4  ;;  %p900_p8 = por %p899_p3, %p898_p1 }
  0x83   : > { %p901_p9 = pnand %p900_p8, %p894_p10 }
  0x85   : > { %904 = shalt.err (!%p901_p9)  }
  0x86   : > { %s905_s20 = scalar_lea.vmem %s1659_s8, 16  ;;  %p912_p0 = scmp.lt.s32.totalorder %s1659_s8, %s1650_s9 }
  0x87   : > { %p906_p12 = scmp.ne.s32.totalorder %s1659_s8, %s905_s20  ;;  %p913_p7 = scmp.lt.s32.totalorder %s1682_s7, %s905_s20 }
  0x89   : > { %p907_p11 = pnand %p906_p12, %p723_p2  ;;  %p914_p4 = por %p913_p7, %p912_p0 }
  0x8b   : > { %p908_p5 = pneg %p907_p11 }
  0x8d   : > { %p915_p6 = pnand %p914_p4, %p908_p5 }
  0x8f   : > { %918 = shalt.err (!%p915_p6)  }
  0x90   : > { %668 = dma.hbm_to_vmem [thread:$0]  (%p723_p2), %s175_s14, 16, %s1659_s8, [#allocation3] }
  0x91   : > { %s2261_s27 = sadd.s32 2, %s1642_s6  ;;  %s1444_s16 = smov [#allocation2 + $0x3]  }
  0x92   : > { %s2293_s27 = smov (!%p723_p2, %s2261_s27), 0  ;;  %s216_s10 = sshll.u32 %s1444_s16, 4  ;;  %s1721_s10 = int_to_ptr.vmem [resolvable:$true] %s216_s10 }
  0x93   : > { %s672_s13 = scalar_select %p723_p2, [#allocation5], [#allocation47] }
  0x94   : > { %s189_s5 = sld [smem:[%s669_s12 + %s2293_s27]]  ;;  %s2295_s21 = smov (!%p723_p2, %s204_s21), 0 }
  0x95   : > { %s220_s25 = sadd.s32 4, %s1642_s6  ;;  %s1724_s30 = sld [smem:[%s672_s13 + %s2295_s21]] }
  0x96   : > { %s675_s20 = scalar_select %p723_p2, [#allocation5], [#allocation48] }
  0x97   : > { %s2297_s25 = smov (!%p723_p2, %s220_s25), 0  ;;  %s1445_s14 = smov [#allocation2 + $0x4]  }
  0x98   : > { %s232_s26 = sshll.u32 %s1445_s14, 4  ;;  %s1733_s16 = sld [smem:[%s675_s20 + %s2297_s25]]  ;;  %s1752_s26 = int_to_ptr.vmem [resolvable:$true] %s232_s26 }
  0x9a   : > { %s625_s8 = sshll.u32 %s189_s5, 4 }
  0x9b   : > { %s191_s27 = scalar_lea.hbm %s2223_s1, %s625_s8 }
  0x9c   : > { %s919_s24 = scalar_lea.hbm %s191_s27, 16  ;;  %p924_p3 = scmp.lt.u32.totalorder %s191_s27, %s2223_s1 }
  0x9d   : > { %p920_p10 = scmp.ne.s32.totalorder %s191_s27, %s919_s24  ;;  %p925_p8 = scmp.lt.u32.totalorder %s1671_s2, %s919_s24 }
  0x9e   : > { %p927_p12 = scmp.lt.u32.totalorder %s919_s24, %s191_s27 }
  0x9f   : > { %p921_p13 = pnand %p920_p10, %p723_p2  ;;  %p926_p9 = por %p925_p8, %p924_p3 }
  0xa1   : > { %p922_p1 = pneg %p921_p13  ;;  %p928_p11 = por %p927_p12, %p926_p9 }
  0xa3   : > { %p929_p5 = pnand %p928_p11, %p922_p1 }
  0xa5   : > { %932 = shalt.err (!%p929_p5)  }
  0xa6   : > { %s933_s17 = scalar_lea.vmem %s1664_s29, 16  ;;  %p940_p6 = scmp.lt.s32.totalorder %s1664_s29, %s1650_s9 }
  0xa7   : > { %p934_p0 = scmp.ne.s32.totalorder %s1664_s29, %s933_s17  ;;  %p941_p10 = scmp.lt.s32.totalorder %s1682_s7, %s933_s17 }
  0xa9   : > { %p935_p7 = pnand %p934_p0, %p723_p2  ;;  %p942_p13 = por %p941_p10, %p940_p6 }
  0xab   : > { %p936_p4 = pneg %p935_p7 }
  0xad   : > { %p943_p3 = pnand %p942_p13, %p936_p4 }
  0xaf   : > { %946 = shalt.err (!%p943_p3)  }
  0xb0   : > { %671 = dma.hbm_to_vmem [thread:$0]  (%p723_p2), %s191_s27, 16, %s1664_s29, [#allocation3] }
  0xb1   : > { %s626_s24 = sshll.u32 %s1724_s30, 4  ;;  %s236_s8 = sadd.s32 5, %s1642_s6 }
  0xb2   : > { %s207_s20 = scalar_lea.hbm %s2223_s1, %s626_s24 }
  0xb3   : > { %s947_s14 = scalar_lea.hbm %s207_s20, 16  ;;  %p952_p12 = scmp.lt.u32.totalorder %s207_s20, %s2223_s1 }
  0xb4   : > { %p948_p1 = scmp.ne.s32.totalorder %s207_s20, %s947_s14  ;;  %p953_p11 = scmp.lt.u32.totalorder %s1671_s2, %s947_s14 }
  0xb5   : > { %p955_p0 = scmp.lt.u32.totalorder %s947_s14, %s207_s20 }
  0xb6   : > { %p949_p8 = pnand %p948_p1, %p723_p2  ;;  %p954_p5 = por %p953_p11, %p952_p12 }
  0xb8   : > { %p950_p9 = pneg %p949_p8  ;;  %p956_p7 = por %p955_p0, %p954_p5 }
  0xba   : > { %p957_p4 = pnand %p956_p7, %p950_p9 }
  0xbc   : > { %960 = shalt.err (!%p957_p4)  }
  0xbd   : > { %s961_s29 = scalar_lea.vmem %s1721_s10, 16  ;;  %p968_p3 = scmp.lt.s32.totalorder %s1721_s10, %s1650_s9 }
  0xbe   : > { %p962_p6 = scmp.ne.s32.totalorder %s1721_s10, %s961_s29  ;;  %p969_p1 = scmp.lt.s32.totalorder %s1682_s7, %s961_s29 }
  0xc0   : > { %p963_p10 = pnand %p962_p6, %p723_p2  ;;  %p970_p8 = por %p969_p1, %p968_p3 }
  0xc2   : > { %p964_p13 = pneg %p963_p10 }
  0xc4   : > { %p971_p11 = pnand %p970_p8, %p964_p13 }
  0xc6   : > { %974 = shalt.err (!%p971_p11)  }
  0xc7   : > { %674 = dma.hbm_to_vmem [thread:$0]  (%p723_p2), %s207_s20, 16, %s1721_s10, [#allocation3] }
  0xc8   : > { %s1776_s30 = scalar_select %p723_p2, [#allocation5], [#allocation49] }
  0xc9   : > { %s627_s27 = sshll.u32 %s1733_s16, 4  ;;  %s1446_s5 = smov [#allocation2 + $0x5]  }
  0xca   : > { %s223_s24 = scalar_lea.hbm %s2223_s1, %s627_s27  ;;  %s248_s25 = sshll.u32 %s1446_s5, 4  ;;  %s1802_s25 = int_to_ptr.vmem [resolvable:$true] %s248_s25 }
  0xcb   : > { %s975_s14 = scalar_lea.hbm %s223_s24, 16  ;;  %p980_p0 = scmp.lt.u32.totalorder %s223_s24, %s2223_s1 }
  0xcc   : > { %p976_p9 = scmp.ne.s32.totalorder %s223_s24, %s975_s14  ;;  %p981_p7 = scmp.lt.u32.totalorder %s1671_s2, %s975_s14 }
  0xcd   : > { %p983_p6 = scmp.lt.u32.totalorder %s975_s14, %s223_s24 }
  0xce   : > { %p977_p12 = pnand %p976_p9, %p723_p2  ;;  %p982_p4 = por %p981_p7, %p980_p0 }
  0xd0   : > { %p978_p5 = pneg %p977_p12  ;;  %p984_p10 = por %p983_p6, %p982_p4 }
  0xd2   : > { %p985_p13 = pnand %p984_p10, %p978_p5 }
  0xd4   : > { %988 = shalt.err (!%p985_p13)  }
  0xd5   : > { %s989_s10 = scalar_lea.vmem %s1752_s26, 16  ;;  %p996_p11 = scmp.lt.s32.totalorder %s1752_s26, %s1650_s9 }
  0xd6   : > { %p990_p3 = scmp.ne.s32.totalorder %s1752_s26, %s989_s10  ;;  %p997_p9 = scmp.lt.s32.totalorder %s1682_s7, %s989_s10 }
  0xd8   : > { %p991_p1 = pnand %p990_p3, %p723_p2  ;;  %p998_p12 = por %p997_p9, %p996_p11 }
  0xda   : > { %p992_p8 = pneg %p991_p1 }
  0xdc   : > { %p999_p0 = pnand %p998_p12, %p992_p8 }
  0xde   : > { %1002 = shalt.err (!%p999_p0)  }
  0xdf   : > { %677 = dma.hbm_to_vmem [thread:$0]  (%p723_p2), %s223_s24, 16, %s1752_s26, [#allocation3] }
  0xe0   : > { %s2299_s8 = smov (!%p723_p2, %s236_s8), 0  ;;  %s252_s16 = sadd.s32 6, %s1642_s6 }
  0xe1   : > { %s237_s20 = sld [smem:[%s1776_s30 + %s2299_s8]]  ;;  %s2301_s16 = smov (!%p723_p2, %s252_s16), 0 }
  0xe2   : > { %s681_s29 = scalar_select %p723_p2, [#allocation5], [#allocation50] }
  0xe3   : > { %s1447_s27 = smov [#allocation2 + $0x6]   ;;  %s268_s17 = sadd.s32 7, %s1642_s6 }
  0xe4   : > { %s264_s13 = sshll.u32 %s1447_s27, 4  ;;  %s1811_s5 = sld [smem:[%s681_s29 + %s2301_s16]]  ;;  %s1813_s13 = int_to_ptr.vmem [resolvable:$true] %s264_s13 }
  0xe5   : > { %s1817_s26 = scalar_select %p723_p2, [#allocation5], [#allocation51] }
  0xe6   : > { %s1448_s30 = smov [#allocation2 + $0x7]  }
  0xe7   : > { %s628_s24 = sshll.u32 %s237_s20, 4  ;;  %s280_s21 = sshll.u32 %s1448_s30, 4  ;;  %s1843_s21 = int_to_ptr.vmem [resolvable:$true] %s280_s21 }
  0xe8   : > { %s239_s8 = scalar_lea.hbm %s2223_s1, %s628_s24 }
  0xe9   : > { %s1003_s10 = scalar_lea.hbm %s239_s8, 16  ;;  %p1008_p6 = scmp.lt.u32.totalorder %s239_s8, %s2223_s1 }
  0xea   : > { %p1004_p5 = scmp.ne.s32.totalorder %s239_s8, %s1003_s10  ;;  %p1009_p10 = scmp.lt.u32.totalorder %s1671_s2, %s1003_s10 }
  0xeb   : > { %p1011_p3 = scmp.lt.u32.totalorder %s1003_s10, %s239_s8 }
  0xec   : > { %p1005_p7 = pnand %p1004_p5, %p723_p2  ;;  %p1010_p13 = por %p1009_p10, %p1008_p6 }
  0xee   : > { %p1006_p4 = pneg %p1005_p7  ;;  %p1012_p1 = por %p1011_p3, %p1010_p13 }
  0xf0   : > { %p1013_p8 = pnand %p1012_p1, %p1006_p4 }
  0xf2   : > { %1016 = shalt.err (!%p1013_p8)  }
  0xf3   : > { %s1017_s20 = scalar_lea.vmem %s1802_s25, 16  ;;  %p1024_p0 = scmp.lt.s32.totalorder %s1802_s25, %s1650_s9 }
  0xf4   : > { %p1018_p11 = scmp.ne.s32.totalorder %s1802_s25, %s1017_s20  ;;  %p1025_p5 = scmp.lt.s32.totalorder %s1682_s7, %s1017_s20 }
  0xf6   : > { %p1019_p9 = pnand %p1018_p11, %p723_p2  ;;  %p1026_p7 = por %p1025_p5, %p1024_p0 }
  0xf8   : > { %p1020_p12 = pneg %p1019_p9 }
  0xfa   : > { %p1027_p6 = pnand %p1026_p7, %p1020_p12 }
  0xfc   : > { %1030 = shalt.err (!%p1027_p6)  }
  0xfd   : > { %680 = dma.hbm_to_vmem [thread:$0]  (%p723_p2), %s239_s8, 16, %s1802_s25, [#allocation3] }
  0xfe   : > { %s2303_s17 = smov (!%p723_p2, %s268_s17), 0  ;;  %s629_s29 = sshll.u32 %s1811_s5, 4 }
  0xff   : > { %s255_s12 = scalar_lea.hbm %s2223_s1, %s629_s29  ;;  %s1849_s30 = sld [smem:[%s1817_s26 + %s2303_s17]] }
 0x100   : > { %s1031_s10 = scalar_lea.hbm %s255_s12, 16  ;;  %p1036_p3 = scmp.lt.u32.totalorder %s255_s12, %s2223_s1 }
 0x101   : > { %p1032_p4 = scmp.ne.s32.totalorder %s255_s12, %s1031_s10  ;;  %p1037_p1 = scmp.lt.u32.totalorder %s1671_s2, %s1031_s10 }
 0x102   : > { %p1039_p11 = scmp.lt.u32.totalorder %s1031_s10, %s255_s12 }
 0x103   : > { %p1033_p10 = pnand %p1032_p4, %p723_p2  ;;  %p1038_p8 = por %p1037_p1, %p1036_p3 }
 0x105   : > { %p1034_p13 = pneg %p1033_p10  ;;  %p1040_p9 = por %p1039_p11, %p1038_p8 }
 0x107   : > { %p1041_p12 = pnand %p1040_p9, %p1034_p13 }
 0x109   : > { %1044 = shalt.err (!%p1041_p12)  }
 0x10a   : > { %s1045_s25 = scalar_lea.vmem %s1813_s13, 16  ;;  %p1052_p6 = scmp.lt.s32.totalorder %s1813_s13, %s1650_s9 }
 0x10b   : > { %p1046_p0 = scmp.ne.s32.totalorder %s1813_s13, %s1045_s25  ;;  %p1053_p4 = scmp.lt.s32.totalorder %s1682_s7, %s1045_s25 }
 0x10d   : > { %p1047_p5 = pnand %p1046_p0, %p723_p2  ;;  %p1054_p10 = por %p1053_p4, %p1052_p6 }
 0x10f   : > { %p1048_p7 = pneg %p1047_p5 }
 0x111   : > { %p1055_p1 = pnand %p1054_p10, %p1048_p7 }
 0x113   : > { %1058 = shalt.err (!%p1055_p1)  }
 0x114   : > { %683 = dma.hbm_to_vmem [thread:$0]  (%p723_p2), %s255_s12, 16, %s1813_s13, [#allocation3] }
 0x115   : > { %s284_s17 = sadd.s32 1, %s1421_s0  ;;  %s658_s5 = sshll.u32 %s1421_s0, 3 }
 0x116   : > { %p1869_p13 = scmp.lt.s32.totalorder %s284_s17, 2  ;;  %s1873_s8 = sand.u32 1, %s284_s17 }
 0x117   : > { %s659_s20 = sadd.s32 8, %s658_s5  ;;  %s634_s24 = sshll.u32 %s1873_s8, 3 }
 0x118   : > { %s2262_s26 = scalar_select %p1869_p13, 1, 0 }
 0x119   : > { %s1876_s29 = sadd.s32 %s659_s20, %s1642_s6  ;;  %s630_s14 = sshll.u32 %s1849_s30, 4 }
 0x11a   : > { %s271_s16 = scalar_lea.hbm %s2223_s1, %s630_s14 }
 0x11b   : > { %s1059_s25 = scalar_lea.hbm %s271_s16, 16  ;;  %p1064_p9 = scmp.lt.u32.totalorder %s271_s16, %s2223_s1 }
 0x11c   : > { %p1060_p3 = scmp.ne.s32.totalorder %s271_s16, %s1059_s25  ;;  %p1065_p12 = scmp.lt.u32.totalorder %s1671_s2, %s1059_s25 }
 0x11d   : > { %p1067_p5 = scmp.lt.u32.totalorder %s1059_s25, %s271_s16 }
 0x11e   : > { %p1061_p8 = pnand %p1060_p3, %p723_p2  ;;  %p1066_p0 = por %p1065_p12, %p1064_p9 }
 0x120   : > { %p1062_p11 = pneg %p1061_p8  ;;  %p1068_p7 = por %p1067_p5, %p1066_p0 }
 0x122   : > { %p1069_p6 = pnand %p1068_p7, %p1062_p11 }
 0x124   : > { %1072 = shalt.err (!%p1069_p6)  }
 0x125   : > { %s1073_s6 = scalar_lea.vmem %s1843_s21, 16  ;;  %p1080_p3 = scmp.lt.s32.totalorder %s1843_s21, %s1650_s9 }
 0x126   : > { %p1074_p4 = scmp.ne.s32.totalorder %s1843_s21, %s1073_s6  ;;  %p1081_p8 = scmp.lt.s32.totalorder %s1682_s7, %s1073_s6 }
 0x128   : > { %p1075_p10 = pnand %p1074_p4, %p723_p2  ;;  %p1082_p13 = por %p1081_p8, %p1080_p3 }
 0x12a   : > { %p1076_p1 = pneg %p1075_p10 }
 0x12c   : > { %p1083_p9 = pnand %p1082_p13, %p1076_p1 }
 0x12e   : > { %1086 = shalt.err (!%p1083_p9)  }
 0x12f   : > { %686 = dma.hbm_to_vmem [thread:$0]  (%p723_p2), %s271_s16, 16, %s1843_s21, [#allocation3] }
 0x130   : > { %p2263_p11 = scmp.ne.s32.totalorder %s2262_s26, 0  ;;  %s1904_s5 = scalar_lea.vmem [#allocation2], %s634_s24 }
 0x131   : > { %s306_s20 = sshll.u32 %s1904_s5, 4  ;;  %s310_s14 = sadd.s32 1, %s1876_s29  ;;  %s1908_s20 = int_to_ptr.vmem [resolvable:$true] %s306_s20 }
 0x132   : > { %s688_s30 = scalar_select %p2263_p11, [#allocation5], [#allocation52] }
 0x133   : > { %s689_s17 = scalar_select %p2263_p11, %s1876_s29, 0 }
 0x134   : > { %s691_s27 = scalar_select %p2263_p11, [#allocation5], [#allocation53] }
 0x135   : > { %s294_s10 = sld [smem:[%s688_s30 + %s689_s17]]  ;;  %s2305_s14 = smov (!%p2263_p11, %s310_s14), 0 }
 0x136   : > { %s533_s21 = scalar_lea.vmem %s1904_s5, 1 [#allocation2]  ;;  %s327_s16 = sadd.s32 2, %s1876_s29 }
 0x137   : > { %s1916_s25 = sld [smem:[%s691_s27 + %s2305_s14]]  ;;  %s323_s24 = sshll.u32 %s533_s21, 4  ;;  %s1918_s24 = int_to_ptr.vmem [resolvable:$true] %s323_s24 }
 0x138   : > { %s538_s13 = scalar_lea.vmem %s1904_s5, 2 [#allocation2]  ;;  %s1927_s22 = scalar_lea.sflag [#allocation3], %s1873_s8 }
 0x139   : > { %s340_s6 = sshll.u32 %s538_s13, 4  ;;  %s1924_s6 = int_to_ptr.vmem [resolvable:$true] %s340_s6 }
 0x13b   : > { %s635_s12 = sshll.u32 %s294_s10, 4 }
 0x13c   : > { %s296_s17 = scalar_lea.hbm %s2223_s1, %s635_s12 }
 0x13d   : > { %s1087_s4 = scalar_lea.hbm %s296_s17, 16  ;;  %p1092_p0 = scmp.lt.u32.totalorder %s296_s17, %s2223_s1 }
 0x13e   : > { %p1088_p2 = scmp.ne.s32.totalorder %s296_s17, %s1087_s4  ;;  %p1093_p5 = scmp.lt.u32.totalorder %s1671_s2, %s1087_s4 }
 0x13f   : > { %p1095_p6 = scmp.lt.u32.totalorder %s1087_s4, %s296_s17 }
 0x140   : > { %p1089_p13 = pnand %p1088_p2, %p2263_p11  ;;  %p1094_p7 = por %p1093_p5, %p1092_p0 }
 0x142   : > { %p1090_p12 = pneg %p1089_p13  ;;  %p1096_p4 = por %p1095_p6, %p1094_p7 }
 0x144   : > { %p1097_p10 = pnand %p1096_p4, %p1090_p12 }
 0x146   : > { %1100 = shalt.err (!%p1097_p10)  }
 0x147   : > { %s1101_s19 = scalar_lea.vmem %s1908_s20, 16  ;;  %p1108_p9 = scmp.lt.s32.totalorder %s1908_s20, %s1650_s9 }
 0x148   : > { %p1102_p1 = scmp.ne.s32.totalorder %s1908_s20, %s1101_s19  ;;  %p1109_p2 = scmp.lt.s32.totalorder %s1682_s7, %s1101_s19 }
 0x14a   : > { %p1103_p3 = pnand %p1102_p1, %p2263_p11  ;;  %p1110_p13 = por %p1109_p2, %p1108_p9 }
 0x14c   : > { %p1104_p8 = pneg %p1103_p3 }
 0x14e   : > { %p1111_p0 = pnand %p1110_p13, %p1104_p8 }
 0x150   : > { %1114 = shalt.err (!%p1111_p0)  }
 0x151   : > { %690 = dma.hbm_to_vmem [thread:$0]  (%p2263_p11), %s296_s17, 16, %s1908_s20, %s1927_s22 }
 0x152   : > { %s694_s4 = scalar_select %p2263_p11, [#allocation5], [#allocation54] }
 0x153   : > { %s636_s8 = sshll.u32 %s1916_s25, 4  ;;  %s344_s10 = sadd.s32 3, %s1876_s29 }
 0x154   : > { %s314_s12 = scalar_lea.hbm %s2223_s1, %s636_s8  ;;  %s543_s30 = scalar_lea.vmem %s1904_s5, 3 [#allocation2] }
 0x155   : > { %s1115_s14 = scalar_lea.hbm %s314_s12, 16  ;;  %p1120_p6 = scmp.lt.u32.totalorder %s314_s12, %s2223_s1 }
 0x156   : > { %p1116_p12 = scmp.ne.s32.totalorder %s314_s12, %s1115_s14  ;;  %p1121_p4 = scmp.lt.u32.totalorder %s1671_s2, %s1115_s14 }
 0x157   : > { %p1123_p1 = scmp.lt.u32.totalorder %s1115_s14, %s314_s12 }
 0x158   : > { %p1117_p5 = pnand %p1116_p12, %p2263_p11  ;;  %p1122_p10 = por %p1121_p4, %p1120_p6 }
 0x15a   : > { %p1118_p7 = pneg %p1117_p5  ;;  %p1124_p3 = por %p1123_p1, %p1122_p10 }
 0x15c   : > { %p1125_p8 = pnand %p1124_p3, %p1118_p7 }
 0x15e   : > { %1128 = shalt.err (!%p1125_p8)  }
 0x15f   : > { %s1129_s20 = scalar_lea.vmem %s1918_s24, 16  ;;  %p1136_p0 = scmp.lt.s32.totalorder %s1918_s24, %s1650_s9 }
 0x160   : > { %p1130_p9 = scmp.ne.s32.totalorder %s1918_s24, %s1129_s20  ;;  %p1137_p12 = scmp.lt.s32.totalorder %s1682_s7, %s1129_s20 }
 0x162   : > { %p1131_p2 = pnand %p1130_p9, %p2263_p11  ;;  %p1138_p5 = por %p1137_p12, %p1136_p0 }
 0x164   : > { %p1132_p13 = pneg %p1131_p2 }
 0x166   : > { %p1139_p4 = pnand %p1138_p5, %p1132_p13 }
 0x168   : > { %1142 = shalt.err (!%p1139_p4)  }
 0x169   : > { %693 = dma.hbm_to_vmem [thread:$0]  (%p2263_p11), %s314_s12, 16, %s1918_s24, %s1927_s22 }
 0x16a   : > { %s2307_s16 = smov (!%p2263_p11, %s327_s16), 0  ;;  %s357_s8 = sshll.u32 %s543_s30, 4  ;;  %s1979_s8 = int_to_ptr.vmem [resolvable:$true] %s357_s8 }
 0x16b   : > { %s697_s25 = scalar_select %p2263_p11, [#allocation5], [#allocation55] }
 0x16c   : > { %s328_s17 = sld [smem:[%s694_s4 + %s2307_s16]]  ;;  %s2309_s10 = smov (!%p2263_p11, %s344_s10), 0 }
 0x16d   : > { %s361_s21 = sadd.s32 4, %s1876_s29  ;;  %s1982_s13 = sld [smem:[%s697_s25 + %s2309_s10]] }
 0x16e   : > { %s548_s14 = scalar_lea.vmem %s1904_s5, 4 [#allocation2]  ;;  %s2311_s21 = smov (!%p2263_p11, %s361_s21), 0 }
 0x16f   : > { %s700_s27 = scalar_select %p2263_p11, [#allocation5], [#allocation56] }
 0x170   : > { %s374_s12 = sshll.u32 %s548_s14, 4  ;;  %s2016_s12 = int_to_ptr.vmem [resolvable:$true] %s374_s12 }
 0x171   : > { %s1992_s4 = sld [smem:[%s700_s27 + %s2311_s21]] }
 0x172   : > { %s638_s24 = sshll.u32 %s328_s17, 4 }
 0x173   : > { %s331_s16 = scalar_lea.hbm %s2223_s1, %s638_s24 }
 0x174   : > { %s1143_s30 = scalar_lea.hbm %s331_s16, 16  ;;  %p1148_p1 = scmp.lt.u32.totalorder %s331_s16, %s2223_s1 }
 0x175   : > { %p1144_p7 = scmp.ne.s32.totalorder %s331_s16, %s1143_s30  ;;  %p1149_p3 = scmp.lt.u32.totalorder %s1671_s2, %s1143_s30 }
 0x176   : > { %p1151_p9 = scmp.lt.u32.totalorder %s1143_s30, %s331_s16 }
 0x177   : > { %p1145_p6 = pnand %p1144_p7, %p2263_p11  ;;  %p1150_p8 = por %p1149_p3, %p1148_p1 }
 0x179   : > { %p1146_p10 = pneg %p1145_p6  ;;  %p1152_p2 = por %p1151_p9, %p1150_p8 }
 0x17b   : > { %p1153_p13 = pnand %p1152_p2, %p1146_p10 }
 0x17d   : > { %1156 = shalt.err (!%p1153_p13)  }
 0x17e   : > { %s1157_s17 = scalar_lea.vmem %s1924_s6, 16  ;;  %p1164_p4 = scmp.lt.s32.totalorder %s1924_s6, %s1650_s9 }
 0x17f   : > { %p1158_p0 = scmp.ne.s32.totalorder %s1924_s6, %s1157_s17  ;;  %p1165_p7 = scmp.lt.s32.totalorder %s1682_s7, %s1157_s17 }
 0x181   : > { %p1159_p12 = pnand %p1158_p0, %p2263_p11  ;;  %p1166_p6 = por %p1165_p7, %p1164_p4 }
 0x183   : > { %p1160_p5 = pneg %p1159_p12 }
 0x185   : > { %p1167_p1 = pnand %p1166_p6, %p1160_p5 }
 0x187   : > { %1170 = shalt.err (!%p1167_p1)  }
 0x188   : > { %696 = dma.hbm_to_vmem [thread:$0]  (%p2263_p11), %s331_s16, 16, %s1924_s6, %s1927_s22 }
 0x189   : > { %s640_s14 = sshll.u32 %s1982_s13, 4 }
 0x18a   : > { %s348_s19 = scalar_lea.hbm %s2223_s1, %s640_s14 }
 0x18b   : > { %s1171_s20 = scalar_lea.hbm %s348_s19, 16  ;;  %p1176_p9 = scmp.lt.u32.totalorder %s348_s19, %s2223_s1 }
 0x18c   : > { %p1172_p10 = scmp.ne.s32.totalorder %s348_s19, %s1171_s20  ;;  %p1177_p2 = scmp.lt.u32.totalorder %s1671_s2, %s1171_s20 }
 0x18d   : > { %p1179_p0 = scmp.lt.u32.totalorder %s1171_s20, %s348_s19 }
 0x18e   : > { %p1173_p3 = pnand %p1172_p10, %p2263_p11  ;;  %p1178_p13 = por %p1177_p2, %p1176_p9 }
 0x190   : > { %p1174_p8 = pneg %p1173_p3  ;;  %p1180_p12 = por %p1179_p0, %p1178_p13 }
 0x192   : > { %p1181_p5 = pnand %p1180_p12, %p1174_p8 }
 0x194   : > { %1184 = shalt.err (!%p1181_p5)  }
 0x195   : > { %s1185_s6 = scalar_lea.vmem %s1979_s8, 16  ;;  %p1192_p1 = scmp.lt.s32.totalorder %s1979_s8, %s1650_s9 }
 0x196   : > { %p1186_p4 = scmp.ne.s32.totalorder %s1979_s8, %s1185_s6  ;;  %p1193_p10 = scmp.lt.s32.totalorder %s1682_s7, %s1185_s6 }
 0x198   : > { %p1187_p7 = pnand %p1186_p4, %p2263_p11  ;;  %p1194_p3 = por %p1193_p10, %p1192_p1 }
 0x19a   : > { %p1188_p6 = pneg %p1187_p7 }
 0x19c   : > { %p1195_p2 = pnand %p1194_p3, %p1188_p6 }
 0x19e   : > { %1198 = shalt.err (!%p1195_p2)  }
 0x19f   : > { %699 = dma.hbm_to_vmem [thread:$0]  (%p2263_p11), %s348_s19, 16, %s1979_s8, %s1927_s22 }
 0x1a0   : > { %s703_s13 = scalar_select %p2263_p11, [#allocation5], [#allocation57] }
 0x1a1   : > { %s642_s16 = sshll.u32 %s1992_s4, 4  ;;  %s378_s25 = sadd.s32 5, %s1876_s29 }
 0x1a2   : > { %s365_s27 = scalar_lea.hbm %s2223_s1, %s642_s16  ;;  %s553_s24 = scalar_lea.vmem %s1904_s5, 5 [#allocation2] }
 0x1a3   : > { %s1199_s20 = scalar_lea.hbm %s365_s27, 16  ;;  %p1204_p0 = scmp.lt.u32.totalorder %s365_s27, %s2223_s1 }
 0x1a4   : > { %p1200_p8 = scmp.ne.s32.totalorder %s365_s27, %s1199_s20  ;;  %p1205_p12 = scmp.lt.u32.totalorder %s1671_s2, %s1199_s20 }
 0x1a5   : > { %p1207_p4 = scmp.lt.u32.totalorder %s1199_s20, %s365_s27 }
 0x1a6   : > { %p1201_p9 = pnand %p1200_p8, %p2263_p11  ;;  %p1206_p5 = por %p1205_p12, %p1204_p0 }
 0x1a8   : > { %p1202_p13 = pneg %p1201_p9  ;;  %p1208_p7 = por %p1207_p4, %p1206_p5 }
 0x1aa   : > { %p1209_p6 = pnand %p1208_p7, %p1202_p13 }
 0x1ac   : > { %1212 = shalt.err (!%p1209_p6)  }
 0x1ad   : > { %s1213_s8 = scalar_lea.vmem %s2016_s12, 16  ;;  %p1220_p2 = scmp.lt.s32.totalorder %s2016_s12, %s1650_s9 }
 0x1ae   : > { %p1214_p1 = scmp.ne.s32.totalorder %s2016_s12, %s1213_s8  ;;  %p1221_p8 = scmp.lt.s32.totalorder %s1682_s7, %s1213_s8 }
 0x1b0   : > { %p1215_p10 = pnand %p1214_p1, %p2263_p11  ;;  %p1222_p9 = por %p1221_p8, %p1220_p2 }
 0x1b2   : > { %p1216_p3 = pneg %p1215_p10 }
 0x1b4   : > { %p1223_p0 = pnand %p1222_p9, %p1216_p3 }
 0x1b6   : > { %1226 = shalt.err (!%p1223_p0)  }
 0x1b7   : > { %702 = dma.hbm_to_vmem [thread:$0]  (%p2263_p11), %s365_s27, 16, %s2016_s12, %s1927_s22 }
 0x1b8   : > { %s2313_s25 = smov (!%p2263_p11, %s378_s25), 0  ;;  %s391_s4 = sshll.u32 %s553_s24, 4  ;;  %s2071_s4 = int_to_ptr.vmem [resolvable:$true] %s391_s4 }
 0x1b9   : > { %s395_s19 = sadd.s32 6, %s1876_s29  ;;  %s379_s6 = sld [smem:[%s703_s13 + %s2313_s25]] }
 0x1ba   : > { %s558_s16 = scalar_lea.vmem %s1904_s5, 6 [#allocation2]  ;;  %s2315_s19 = smov (!%p2263_p11, %s395_s19), 0 }
 0x1bb   : > { %s706_s17 = scalar_select %p2263_p11, [#allocation5], [#allocation58] }
 0x1bc   : > { %s408_s14 = sshll.u32 %s558_s16, 4  ;;  %s412_s12 = sadd.s32 7, %s1876_s29  ;;  %s2078_s14 = int_to_ptr.vmem [resolvable:$true] %s408_s14 }
 0x1bd   : > { %s2073_s20 = sld [smem:[%s706_s17 + %s2315_s19]]  ;;  %s563_s25 = scalar_lea.vmem %s1904_s5, 7 [#allocation2] }
 0x1be   : > { %s709_s27 = scalar_select %p2263_p11, [#allocation5], [#allocation59] }
 0x1bf   : > { %s644_s24 = sshll.u32 %s379_s6, 4 }
 0x1c0   : > { %s382_s13 = scalar_lea.hbm %s2223_s1, %s644_s24 }
 0x1c1   : > { %s1227_s8 = scalar_lea.hbm %s382_s13, 16  ;;  %p1232_p4 = scmp.lt.u32.totalorder %s382_s13, %s2223_s1 }
 0x1c2   : > { %p1228_p13 = scmp.ne.s32.totalorder %s382_s13, %s1227_s8  ;;  %p1233_p7 = scmp.lt.u32.totalorder %s1671_s2, %s1227_s8 }
 0x1c3   : > { %p1235_p1 = scmp.lt.u32.totalorder %s1227_s8, %s382_s13 }
 0x1c4   : > { %p1229_p12 = pnand %p1228_p13, %p2263_p11  ;;  %p1234_p6 = por %p1233_p7, %p1232_p4 }
 0x1c6   : > { %p1230_p5 = pneg %p1229_p12  ;;  %p1236_p10 = por %p1235_p1, %p1234_p6 }
 0x1c8   : > { %p1237_p3 = pnand %p1236_p10, %p1230_p5 }
 0x1ca   : > { %1240 = shalt.err (!%p1237_p3)  }
 0x1cb   : > { %s1241_s29 = scalar_lea.vmem %s2071_s4, 16  ;;  %p1248_p0 = scmp.lt.s32.totalorder %s2071_s4, %s1650_s9 }
 0x1cc   : > { %p1242_p2 = scmp.ne.s32.totalorder %s2071_s4, %s1241_s29  ;;  %p1249_p13 = scmp.lt.s32.totalorder %s1682_s7, %s1241_s29 }
 0x1ce   : > { %p1243_p8 = pnand %p1242_p2, %p2263_p11  ;;  %p1250_p12 = por %p1249_p13, %p1248_p0 }
 0x1d0   : > { %p1244_p9 = pneg %p1243_p8 }
 0x1d2   : > { %p1251_p4 = pnand %p1250_p12, %p1244_p9 }
 0x1d4   : > { %1254 = shalt.err (!%p1251_p4)  }
 0x1d5   : > { %705 = dma.hbm_to_vmem [thread:$0]  (%p2263_p11), %s382_s13, 16, %s2071_s4, %s1927_s22 }
 0x1d6   : > { %s2317_s12 = smov (!%p2263_p11, %s412_s12), 0  ;;  %s646_s5 = sshll.u32 %s2073_s20, 4 }
 0x1d7   : > { %s425_s21 = sshll.u32 %s563_s25, 4  ;;  %s399_s17 = scalar_lea.hbm %s2223_s1, %s646_s5  ;;  %s426_s21 = int_to_ptr.vmem [resolvable:$true] %s425_s21 }
 0x1d8   : > { %s413_s24 = sld [smem:[%s709_s27 + %s2317_s12]]  ;;  %s1255_s30 = scalar_lea.hbm %s399_s17, 16 }
 0x1d9   : > { %p1256_p5 = scmp.ne.s32.totalorder %s399_s17, %s1255_s30  ;;  %p1260_p1 = scmp.lt.u32.totalorder %s399_s17, %s2223_s1 }
 0x1da   : > { %p1261_p10 = scmp.lt.u32.totalorder %s1671_s2, %s1255_s30  ;;  %p1263_p2 = scmp.lt.u32.totalorder %s1255_s30, %s399_s17 }
 0x1db   : > { %p1257_p7 = pnand %p1256_p5, %p2263_p11 }
 0x1dc   : > { %p1262_p3 = por %p1261_p10, %p1260_p1 }
 0x1dd   : > { %p1258_p6 = pneg %p1257_p7 }
 0x1de   : > { %p1264_p8 = por %p1263_p2, %p1262_p3 }
 0x1e0   : > { %p1265_p9 = pnand %p1264_p8, %p1258_p6 }
 0x1e2   : > { %1268 = shalt.err (!%p1265_p9)  }
 0x1e3   : > { %s1269_s4 = scalar_lea.vmem %s2078_s14, 16  ;;  %p1276_p4 = scmp.lt.s32.totalorder %s2078_s14, %s1650_s9 }
 0x1e4   : > { %p1270_p0 = scmp.ne.s32.totalorder %s2078_s14, %s1269_s4  ;;  %p1277_p5 = scmp.lt.s32.totalorder %s1682_s7, %s1269_s4 }
 0x1e6   : > { %p1271_p13 = pnand %p1270_p0, %p2263_p11  ;;  %p1278_p7 = por %p1277_p5, %p1276_p4 }
 0x1e8   : > { %p1272_p12 = pneg %p1271_p13 }
 0x1ea   : > { %p1279_p1 = pnand %p1278_p7, %p1272_p12 }
 0x1ec   : > { %1282 = shalt.err (!%p1279_p1)  }
 0x1ed   : > { %708 = dma.hbm_to_vmem [thread:$0]  (%p2263_p11), %s399_s17, 16, %s2078_s14, %s1927_s22 }
 0x1ee   : > { %s2264_s20 = sand.u32 1, %s1421_s0  ;;  %s648_s27 = sshll.u32 %s413_s24, 4 }
 0x1ef   : > { %s2129_s12 = sshll.u32 %s2264_s20, 3  ;;  %s416_s16 = scalar_lea.hbm %s2223_s1, %s648_s27 }
 0x1f0   : > { %s1283_s29 = scalar_lea.hbm %s416_s16, 16  ;;  %p1288_p2 = scmp.lt.u32.totalorder %s416_s16, %s2223_s1 }
 0x1f1   : > { %p1284_p6 = scmp.ne.s32.totalorder %s416_s16, %s1283_s29  ;;  %p1289_p8 = scmp.lt.u32.totalorder %s1671_s2, %s1283_s29 }
 0x1f2   : > { %p1291_p0 = scmp.lt.u32.totalorder %s1283_s29, %s416_s16 }
 0x1f3   : > { %p1285_p10 = pnand %p1284_p6, %p2263_p11  ;;  %p1290_p9 = por %p1289_p8, %p1288_p2 }
 0x1f5   : > { %p1286_p3 = pneg %p1285_p10  ;;  %p1292_p13 = por %p1291_p0, %p1290_p9 }
 0x1f7   : > { %p1293_p12 = pnand %p1292_p13, %p1286_p3 }
 0x1f9   : > { %1296 = shalt.err (!%p1293_p12)  }
 0x1fa   : > { %s1297_s14 = scalar_lea.vmem %s426_s21, 16  ;;  %p1304_p1 = scmp.lt.s32.totalorder %s426_s21, %s1650_s9 }
 0x1fb   : > { %p1298_p4 = scmp.ne.s32.totalorder %s426_s21, %s1297_s14  ;;  %p1305_p6 = scmp.lt.s32.totalorder %s1682_s7, %s1297_s14 }
 0x1fd   : > { %p1299_p5 = pnand %p1298_p4, %p2263_p11  ;;  %p1306_p10 = por %p1305_p6, %p1304_p1 }
 0x1ff   : > { %p1300_p7 = pneg %p1299_p5 }
 0x201   : > { %p1307_p2 = pnand %p1306_p10, %p1300_p7 }
 0x203   : > { %1310 = shalt.err (!%p1307_p2)  }
 0x204   : > { %711 = dma.hbm_to_vmem [thread:$0]  (%p2263_p11), %s416_s16, 16, %s426_s21, %s1927_s22 }
 0x205   : > { %s151_s2 = scalar_lea.vmem [#allocation9], %s1638_s15  ;;  %s432_s6 = scalar_lea.vmem [#allocation2], %s2129_s12 }
 0x206   : > { %s2265_s17 = smov %s2264_s20 }
 0x207   : > { %s433_s24 = scalar_lea.sflag [#allocation3], %s2265_s17 }
 0x208   : > { %1389 = dma.done.wait %s433_s24, 128 }
 0x209   : > { %1390 = vsyncadd %s433_s24, 4294967168  ;;  %s652_s9 = sshll.u32 %s1425_s28, 1  ;;  %s457_s26 = sshll.u32 %s151_s2, 4  ;;  %v437_v0 = vld [vmem:[%s432_s6] sm:$0xff]  ;;  %s2160_s26 = int_to_ptr.vmem [resolvable:$true] %s457_s26 }
 0x20a   : > { %s453_s7 = sadd.s32 %s1421_s0, %s652_s9  ;;  %s2266_s10 = scalar_lea.vmem [#allocation6], %s1628_s11 }
 0x20b   : > { %s653_s30 = sshll.u32 %s453_s7, 7  ;;  %v438_v1 = vld [vmem:[%s2266_s10] sm:$0xff]  ;;  %s2267_s8 = sand.u32 1, %s1401_s23  }
 0x20c   : > { %v439_v2 = vadd.f32 %v438_v1, %v437_v0  ;;  %s2158_s21 = scalar_lea.hbm %s2225_s3, %s653_s30  ;;  %s442_s28 = scalar_lea.sflag [#allocation8], %s2267_s8 }
 0x20d   : > { %s1311_s0 = scalar_lea.vmem %s2160_s26, 128  ;;  %p2268_p3 = scmp.ne.s32.totalorder %s2254_s18, 0 }
 0x20e   : > { %440 = vst [vmem:[%s151_s2] sm:$0xff] %v439_v2  ;;  %p1312_p11 = scmp.ne.s32.totalorder %s2160_s26, %s1311_s0  ;;  %s1449_s11 = smov [#allocation9]  }
 0x20f   : > { %s1315_s4 = sshll.u32 %s1449_s11, 4  ;;  %s1316_s4 = int_to_ptr.vmem [resolvable:$false] %s1315_s4 }
 0x210   : > { %p1313_p8 = pnand %p1312_p11, %p2268_p3  ;;  %s1317_s20 = scalar_lea.vmem %s1316_s4, 256 }
 0x211   : > { %p1318_p0 = scmp.lt.s32.totalorder %s2160_s26, %s1316_s4  ;;  %p1319_p13 = scmp.lt.s32.totalorder %s1317_s20, %s1311_s0 }
 0x212   : > { %p1314_p9 = pneg %p1313_p8 }
 0x213   : > { %p1320_p12 = por %p1319_p13, %p1318_p0 }
 0x215   : > { %p1321_p4 = pnand %p1320_p12, %p1314_p9 }
 0x217   : > { %1324 = shalt.err (!%p1321_p4)
}
 0x218   : > { %s1325_s12 = scalar_lea.hbm %s2158_s21, 128  ;;  %s1329_s25 = scalar_lea.hbm %s2225_s3, 512 }
 0x219   : > { %p1326_p5 = scmp.ne.s32.totalorder %s2158_s21, %s1325_s12  ;;  %p1330_p6 = scmp.lt.u32.totalorder %s2158_s21, %s2225_s3 }
 0x21a   : > { %p1331_p10 = scmp.lt.u32.totalorder %s1329_s25, %s1325_s12  ;;  %p1333_p11 = scmp.lt.u32.totalorder %s1325_s12, %s2158_s21 }
 0x21b   : > { %p1327_p7 = pnand %p1326_p5, %p2268_p3 }
 0x21c   : > { %p1332_p2 = por %p1331_p10, %p1330_p6 }
 0x21d   : > { %p1328_p1 = pneg %p1327_p7 }
 0x21e   : > { %p1334_p8 = por %p1333_p11, %p1332_p2 }
 0x220   : > { %p1335_p9 = pnand %p1334_p8, %p1328_p1 }
 0x222   : > { %1338 = shalt.err (!%p1335_p9)
}
 0x223   : > { %712 = dma.vmem_to_hbm [thread:$0]  (%p2268_p3), %s2160_s26, 128, %s2158_s21, %s442_s28  }
 0x224 PF: > { %s2269_s5 = sld [smem:[#allocation70_spill]]  ;;  %s2270_s19 = sld [smem:[#allocation64_spill]] }
 0x225   : > { %s2271_s14 = sld [smem:[#allocation75_spill]] }
 0x22a   : > { %p725_p0 = scmp.ge.s32.totalorder %s2269_s5, 2  ;;  %s469_s2 = sand.u32 1, %s2270_s19  }
 0x22b   : > { %p2272_p13 = scmp.ne.s32.totalorder %s2271_s14, 0  ;;  %s470_s6 = scalar_lea.sflag [#allocation8], %s469_s2 }
 0x22d   : > { %p719_p12 = pnand %p725_p0, %p2272_p13 }
 0x22f   : > { %1392 = dma.done.wait (!%p719_p12), %s470_s6, 128  }
 0x230   : > { %1394 = vsyncadd (!%p719_p12), %s470_s6, 4294967168  ;;  %s23_s4 = sadd.s32 1, %s2269_s5   ;;  %s2273_s17 = sld [smem:[#allocation65_spill]] }
 0x231   : > { %p20_p4 = scmp.ge.s32.totalorder %s23_s4, 6   ;;  %s2274_s24 = sld [smem:[#allocation74_spill]] }
 0x232   : > { %s2275_s25 = sld [smem:[#allocation66_spill]]  ;;  %s2276_s26 = sld [smem:[#allocation67_spill]] }
 0x233   : > { %s2277_s27 = sld [smem:[#allocation73_spill]]  ;;  %s2278_s0 = sld [smem:[#allocation68_spill]] }
 0x234   : > { %s2279_s28 = sld [smem:[#allocation69_spill]]  ;;  %s2280_s29 = sld [smem:[#allocation71_spill]] }
 0x235   : > { %s2281_s30 = sld [smem:[#allocation72_spill]]  ;;  %s2282_s22 = smov %s1401_s23 }
 0x236   : > { %s2283_s23 = smov %s2273_s17  ;;  %22 = sbr.rel (!%p20_p4) target bundleno = 21 (0x15), region = 176 }
 0x23d   :  { %475 = vsyncpa [#allocation7], 1 }
 0x23e   :  { %477 = vsyncpa [#allocation7 + $0x1], 1 }
 0x23f   :  { %478 = vsyncpa [#allocation8], 1 }
 0x240   :  { %480 = vsyncpa [#allocation8 + $0x1], 1 }
 0x241   :  { %481 = vsyncmov [#allocation3] }
 0x244   :  { %s482_s18 = vpop.sfrf %481 }
 0x245   :  { %p656_p3 = scmp.ne.s32.totalorder %s482_s18, 0 }
 0x247   :  { %486 = shalt.err (%p656_p3)  }
 0x248   :  { %488 = vsyncmov [#allocation3 + $0x1] }
 0x24b   :  { %s489_s9 = vpop.sfrf %488 }
 0x24c   :  { %p657_p5 = scmp.ne.s32.totalorder %s489_s9, 0 }
 0x24e   :  { %493 = shalt.err (%p657_p5)  }

</bundles_post_ra>
